<compile_context>
chip_gen: v7x
topology: tpu7x:2x2x1
jax: 0.10.0
libtpu: 0.0.40
codegen_flags: <defaults>
</compile_context>

<pallas_src>
import math

import jax
import jax.numpy as jnp
from jax.experimental import pallas as pl
from jax.experimental.pallas import tpu as pltpu

SIGMA = 0.5     # fixed in the reference forward()
V = 1.0         # degrees of freedom of the Student-t kernel (default v=1)


def sdcn_kernel(x_ref, adj_ref,
                wfx, be1, we2, be2, we3, be3, wz, bz,
                wfz, bd1, wd2, bd2, wd3, bd3, wxb, bxb,
                wg2, wg3, wg4, wg5,
                mu_sq_ref,
                xbar_ref, packed_ref):
    f32 = jnp.float32
    bf16 = jnp.bfloat16

    x = x_ref[...]        # bf16 [N, n_input]
    adj = adj_ref[...]    # bf16 [N, N]

    def mm(h, w_ref):
        # bf16 x bf16 -> f32 accumulation on the MXU.
        return jnp.dot(h.astype(bf16), w_ref[...], preferred_element_type=f32)

    def linear(h, w_ref, b_ref, relu=True):
        y = mm(h, w_ref) + b_ref[...]
        return jnp.maximum(y, 0.0) if relu else y

    def gnn_from_support(support, relu=True):
        out = jnp.dot(adj, support.astype(bf16), preferred_element_type=f32)
        return jnp.maximum(out, 0.0) if relu else out

    def gnn(h, w_ref, relu=True):
        return gnn_from_support(mm(h, w_ref), relu)

    # ---------------- AE encoder + first GNN support (fused over x) --------
    n_e1 = be1.shape[1]
    y0 = mm(x, wfx)                                   # [N, 2*n_enc_1]
    tra1 = jnp.maximum(y0[:, :n_e1] + be1[...], 0.0)  # relu(enc_1(x))
    sup1 = y0[:, n_e1:]                               # x @ wg1 (GNN-1 support)

    tra2 = linear(tra1, we2, be2)                     # relu(enc_2)
    tra3 = linear(tra2, we3, be3)                     # relu(enc_3)
    z = linear(tra3, wz, bz, relu=False)              # z_layer

    # ---------------- AE decoder + Student-t cross term (fused over z) -----
    n_d1 = bd1.shape[1]
    yz = mm(z, wfz)                                   # [N, n_dec_1 + C]
    dec1 = jnp.maximum(yz[:, :n_d1] + bd1[...], 0.0)  # relu(dec_1(z))
    cross = yz[:, n_d1:]                              # z @ mu^T   [N, C]

    dec2 = linear(dec1, wd2, bd2)
    dec3 = linear(dec2, wd3, bd3)
    x_bar = linear(dec3, wxb, bxb, relu=False)

    # ---------------- GCN branch ----------------
    h = gnn_from_support(sup1)                        # gnn_1(x, adj)
    h = gnn((1.0 - SIGMA) * h + SIGMA * tra1, wg2)
    h = gnn((1.0 - SIGMA) * h + SIGMA * tra2, wg3)
    h = gnn((1.0 - SIGMA) * h + SIGMA * tra3, wg4)
    h = gnn((1.0 - SIGMA) * h + SIGMA * z, wg5, relu=False)

    # predict = softmax(h, dim=1)
    h_shift = h - jnp.max(h, axis=1, keepdims=True)
    eh = jnp.exp(h_shift)
    predict = eh * pl.reciprocal(jnp.sum(eh, axis=1, keepdims=True), approx=True)

    # Student-t soft assignment via the matmul identity:
    #   ||z_i - mu_j||^2 = ||z_i||^2 + ||mu_j||^2 - 2 <z_i, mu_j>
    z_sq = jnp.sum(z * z, axis=1, keepdims=True)                 # [N, 1]
    dist2 = jnp.maximum(z_sq + mu_sq_ref[...] - 2.0 * cross, 0.0)
    q = 1.0 / (1.0 + dist2 * (1.0 / V))
    exponent = (V + 1.0) / 2.0
    if exponent != 1.0:  # Python-level constant: skip identity pow (EUP exp/log)
        q = q ** exponent
    q = q * pl.reciprocal(jnp.sum(q, axis=1, keepdims=True), approx=True)

    # ---------------- outputs ----------------
    xbar_ref[...] = x_bar

    # Pack the narrow outputs into one lane-dense slab: [q | predict | z | pad].
    used = q.shape[1] + predict.shape[1] + z.shape[1]
    parts = [q, predict, z]
    pad = packed_ref.shape[1] - used
    if pad > 0:
        parts.append(jnp.zeros((q.shape[0], pad), f32))
    packed_ref[...] = jnp.concatenate(parts, axis=1)


def _vmem_limit_bytes(resident_bytes):
    """Scoped-VMEM limit: enough for the resident working set (v5e's 16 MiB
    default is the first to bite), clamped below physical VMEM (v7x: 64 MiB)."""
    phys = 64 << 20  # conservative: smallest per-core physical VMEM (v7x)
    try:
        info = pltpu.get_tpu_info()
        phys = int(getattr(info, "vmem_capacity_bytes", phys))
    except Exception:
        pass
    want = max(16 << 20, 2 * int(resident_bytes))
    return int(min(want, (phys * 9) // 10))


def _compiler_params(vmem_limit):
    try:
        return pltpu.CompilerParams(vmem_limit_bytes=vmem_limit)
    except Exception:
        return None


def _sdcn_forward_impl(x, adj, p):
    """x: [N, n_input] bf16, adj: [N, N] bf16, p: prepared params (see
    prepare_params). Returns (x_bar, q, predict, z) — all f32."""
    N, n_input = x.shape
    n_z = p["wz"].shape[1]
    n_clusters = p["wg5"].shape[1]
    packed_w = max(128, ((2 * n_clusters + n_z + 127) // 128) * 128)
    f32 = jnp.float32

    inputs = [
        x, adj,
        p["wfx"], p["be1"],
        p["we2"], p["be2"],
        p["we3"], p["be3"],
        p["wz"], p["bz"],
        p["wfz"], p["bd1"],
        p["wd2"], p["bd2"],
        p["wd3"], p["bd3"],
        p["wxb"], p["bxb"],
        p["wg2"], p["wg3"], p["wg4"], p["wg5"],
        p["mu_sq"],
    ]

    out_shape = (
        jax.ShapeDtypeStruct((N, n_input), f32),    # x_bar
        jax.ShapeDtypeStruct((N, packed_w), f32),   # [q | predict | z | pad]
    )

    # Rough resident working-set estimate (inputs + outputs + activations).
    in_bytes = sum(a.size * a.dtype.itemsize for a in inputs)
    out_bytes = N * n_input * 4 + N * packed_w * 4
    act_bytes = 12 * N * max(n_input, 128) * 4
    vmem_limit = _vmem_limit_bytes(in_bytes + out_bytes + act_bytes)

    vmem = pl.BlockSpec(memory_space=pltpu.MemorySpace.VMEM)
    x_bar, packed = pl.pallas_call(
        sdcn_kernel,
        out_shape=out_shape,
        in_specs=[vmem] * len(inputs),
        out_specs=(vmem, vmem),
        compiler_params=_compiler_params(vmem_limit),
    )(*inputs)

    q = packed[:, :n_clusters]
    predict = packed[:, n_clusters:2 * n_clusters]
    z = packed[:, 2 * n_clusters:2 * n_clusters + n_z]
    return x_bar, q, predict, z


sdcn_forward = jax.jit(_sdcn_forward_impl)


# ---------------------------------------------------------------------------
# One-time parameter preparation (weight fusion, mu transpose, ||mu||^2).
# ---------------------------------------------------------------------------
def prepare_params(params):
    bf16 = jnp.bfloat16
    f32 = jnp.float32
    p = {k: v for k, v in params.items()
         if k not in ("we1", "wg1", "wd1", "mu")}
    # Fused first-layer weight: [x@we1 | x@wg1] in one MXU pass over x.
    p["wfx"] = jnp.concatenate(
        [params["we1"].astype(bf16), params["wg1"].astype(bf16)], axis=1)
    # Fused z-layer weight: [z@wd1 | z@mu^T] in one MXU pass over z.
    p["wfz"] = jnp.concatenate(
        [params["wd1"].astype(bf16), params["mu"].T.astype(bf16)], axis=1)
    mu = params["mu"].astype(f32)
    p["mu_sq"] = jnp.sum(mu * mu, axis=1)[None, :]   # [1, C] f32
    return p


# ---------------------------------------------------------------------------
# Deterministic parameter construction (synthetic, matches module shapes).
# Weights are stored bf16 at rest (MXU-native); biases / cluster centers f32.
# ---------------------------------------------------------------------------
def _xavier_normal(key, shape, dtype=jnp.bfloat16):
    fan_in, fan_out = shape[0], shape[1]
    std = math.sqrt(2.0 / (fan_in + fan_out))
    return (std * jax.random.normal(key, shape, dtype=jnp.float32)).astype(dtype)


def _linear_init(key, n_in, n_out):
    # PyTorch Linear default: U(-1/sqrt(n_in), 1/sqrt(n_in)); stored as [in, out].
    kw, kb = jax.random.split(key)
    bound = 1.0 / math.sqrt(n_in)
    w = jax.random.uniform(kw, (n_in, n_out), jnp.float32, -bound, bound)
    b = jax.random.uniform(kb, (1, n_out), jnp.float32, -bound, bound)
    return w.astype(jnp.bfloat16), b


def init_params(key, dims):
    (n_enc_1, n_enc_2, n_enc_3, n_dec_1, n_dec_2, n_dec_3,
     n_input, n_z, n_clusters) = dims
    keys = jax.random.split(key, 16)
    p = {}
    p["we1"], p["be1"] = _linear_init(keys[0], n_input, n_enc_1)
    p["we2"], p["be2"] = _linear_init(keys[1], n_enc_1, n_enc_2)
    p["we3"], p["be3"] = _linear_init(keys[2], n_enc_2, n_enc_3)
    p["wz"],  p["bz"]  = _linear_init(keys[3], n_enc_3, n_z)
    p["wd1"], p["bd1"] = _linear_init(keys[4], n_z, n_dec_1)
    p["wd2"], p["bd2"] = _linear_init(keys[5], n_dec_1, n_dec_2)
    p["wd3"], p["bd3"] = _linear_init(keys[6], n_dec_2, n_dec_3)
    p["wxb"], p["bxb"] = _linear_init(keys[7], n_dec_3, n_input)
    # GNNLayer weights ([in, out], xavier init; GNNLayer has no bias)
    p["wg1"] = _xavier_normal(keys[8],  (n_input, n_enc_1))
    p["wg2"] = _xavier_normal(keys[9],  (n_enc_1, n_enc_2))
    p["wg3"] = _xavier_normal(keys[10], (n_enc_2, n_enc_3))
    p["wg4"] = _xavier_normal(keys[11], (n_enc_3, n_z))
    p["wg5"] = _xavier_normal(keys[12], (n_z, n_clusters))
    # cluster_layer (xavier_normal_), kept f32 so ||mu||^2 stays precise.
    p["mu"] = _xavier_normal(keys[13], (n_clusters, n_z), dtype=jnp.float32)
    return p


def make_adj(key, n_nodes):
    """Symmetric, self-looped, D^-1/2 A D^-1/2 normalized dense adjacency (bf16)."""
    a = (jax.random.uniform(key, (n_nodes, n_nodes)) < 0.15).astype(jnp.float32)
    a = jnp.maximum(a, a.T)
    a = a + jnp.eye(n_nodes, dtype=jnp.float32)
    d = jnp.sum(a, axis=1)
    d_inv_sqrt = 1.0 / jnp.sqrt(d)
    return (a * d_inv_sqrt[:, None] * d_inv_sqrt[None, :]).astype(jnp.bfloat16)


if __name__ == "__main__":
    # Small shapes consistent with the module's forward.
    N = 64            # number of graph nodes (rows of x / adj)
    n_input = 128
    n_enc_1, n_enc_2, n_enc_3 = 64, 64, 128
    n_dec_1, n_dec_2, n_dec_3 = 128, 64, 64
    n_z = 16
    n_clusters = 8

    key = jax.random.PRNGKey(0)
    k_x, k_adj, k_par = jax.random.split(key, 3)

    x = jax.random.normal(k_x, (N, n_input), dtype=jnp.float32).astype(jnp.bfloat16)
    adj = make_adj(k_adj, N)
    params = init_params(
        k_par,
        (n_enc_1, n_enc_2, n_enc_3, n_dec_1, n_dec_2, n_dec_3,
         n_input, n_z, n_clusters),
    )
    prepared = prepare_params(params)        # one-time weight fusion / mu_sq
    jax.block_until_ready(prepared)

    x_bar, q, predict, z = sdcn_forward(x, adj, prepared)
    jax.block_until_ready((x_bar, q, predict, z))

    assert x_bar.shape == (N, n_input)
    assert q.shape == (N, n_clusters)
    assert predict.shape == (N, n_clusters)
    assert z.shape == (N, n_z)
    # TODO(synk): original forward also print()s z / h shapes (host-side I/O);
    # omitted to keep stdout limited to the success marker.
    print("KERNEL_OK")
</pallas_src>

<mosaic_0001>
module attributes {stable_mosaic.version = 11 : i64} {
  func.func @sdcn_kernel(%arg0: memref<64x128xbf16, #tpu.memory_space<vmem>>, %arg1: memref<64x64xbf16, #tpu.memory_space<vmem>>, %arg2: memref<128x128xbf16, #tpu.memory_space<vmem>>, %arg3: memref<1x64xf32, #tpu.memory_space<vmem>>, %arg4: memref<64x64xbf16, #tpu.memory_space<vmem>>, %arg5: memref<1x64xf32, #tpu.memory_space<vmem>>, %arg6: memref<64x128xbf16, #tpu.memory_space<vmem>>, %arg7: memref<1x128xf32, #tpu.memory_space<vmem>>, %arg8: memref<128x16xbf16, #tpu.memory_space<vmem>>, %arg9: memref<1x16xf32, #tpu.memory_space<vmem>>, %arg10: memref<16x136xbf16, #tpu.memory_space<vmem>>, %arg11: memref<1x128xf32, #tpu.memory_space<vmem>>, %arg12: memref<128x64xbf16, #tpu.memory_space<vmem>>, %arg13: memref<1x64xf32, #tpu.memory_space<vmem>>, %arg14: memref<64x64xbf16, #tpu.memory_space<vmem>>, %arg15: memref<1x64xf32, #tpu.memory_space<vmem>>, %arg16: memref<64x128xbf16, #tpu.memory_space<vmem>>, %arg17: memref<1x128xf32, #tpu.memory_space<vmem>>, %arg18: memref<64x64xbf16, #tpu.memory_space<vmem>>, %arg19: memref<64x128xbf16, #tpu.memory_space<vmem>>, %arg20: memref<128x16xbf16, #tpu.memory_space<vmem>>, %arg21: memref<16x8xbf16, #tpu.memory_space<vmem>>, %arg22: memref<1x8xf32, #tpu.memory_space<vmem>>, %arg23: memref<64x128xf32, #tpu.memory_space<vmem>>, %arg24: memref<64x128xf32, #tpu.memory_space<vmem>>) attributes {dimension_semantics = [], scalar_prefetch = 0 : i64, scratch_operands = 0 : i64, tpu.core_type = #tpu.core_type<tc>} {
    %c0 = arith.constant 0 : index
    %c0_0 = arith.constant 0 : index
    %0 = vector.load %arg0[%c0, %c0_0] : memref<64x128xbf16, #tpu.memory_space<vmem>>, vector<64x128xbf16>
    %c0_1 = arith.constant 0 : index
    %c0_2 = arith.constant 0 : index
    %1 = vector.load %arg1[%c0_1, %c0_2] : memref<64x64xbf16, #tpu.memory_space<vmem>>, vector<64x64xbf16>
    %c0_3 = arith.constant 0 : index
    %c0_4 = arith.constant 0 : index
    %2 = vector.load %arg2[%c0_3, %c0_4] : memref<128x128xbf16, #tpu.memory_space<vmem>>, vector<128x128xbf16>
    %cst = arith.constant dense<0.000000e+00> : vector<64x128xf32>
    %3 = tpu.matmul %0, %2, %cst {dimension_numbers = #tpu.dot_dimension_numbers<[1], [0], [0], [1], [0, 0, 1, 1], [], []>} : vector<64x128xbf16>, vector<128x128xbf16>, vector<64x128xf32> -> vector<64x128xf32>
    %4 = vector.extract_strided_slice %3 {offsets = [0, 0], sizes = [64, 64], strides = [1, 1]} : vector<64x128xf32> to vector<64x64xf32>
    %c0_5 = arith.constant 0 : index
    %c0_6 = arith.constant 0 : index
    %5 = vector.load %arg3[%c0_5, %c0_6] : memref<1x64xf32, #tpu.memory_space<vmem>>, vector<1x64xf32>
    %6 = vector.broadcast %5 : vector<1x64xf32> to vector<64x64xf32>
    %7 = arith.addf %4, %6 : vector<64x64xf32>
    %cst_7 = arith.constant 0.000000e+00 : f32
    %8 = vector.broadcast %cst_7 : f32 to vector<64x64xf32>
    %9 = arith.maximumf %7, %8 : vector<64x64xf32>
    %10 = vector.extract_strided_slice %3 {offsets = [0, 64], sizes = [64, 64], strides = [1, 1]} : vector<64x128xf32> to vector<64x64xf32>
    %11 = arith.truncf %9 : vector<64x64xf32> to vector<64x64xbf16>
    %c0_8 = arith.constant 0 : index
    %c0_9 = arith.constant 0 : index
    %12 = vector.load %arg4[%c0_8, %c0_9] : memref<64x64xbf16, #tpu.memory_space<vmem>>, vector<64x64xbf16>
    %cst_10 = arith.constant dense<0.000000e+00> : vector<64x64xf32>
    %13 = tpu.matmul %11, %12, %cst_10 {dimension_numbers = #tpu.dot_dimension_numbers<[1], [0], [0], [1], [0, 0, 1, 1], [], []>} : vector<64x64xbf16>, vector<64x64xbf16>, vector<64x64xf32> -> vector<64x64xf32>
    %c0_11 = arith.constant 0 : index
    %c0_12 = arith.constant 0 : index
    %14 = vector.load %arg5[%c0_11, %c0_12] : memref<1x64xf32, #tpu.memory_space<vmem>>, vector<1x64xf32>
    %15 = vector.broadcast %14 : vector<1x64xf32> to vector<64x64xf32>
    %16 = arith.addf %13, %15 : vector<64x64xf32>
    %cst_13 = arith.constant 0.000000e+00 : f32
    %17 = vector.broadcast %cst_13 : f32 to vector<64x64xf32>
    %18 = arith.maximumf %16, %17 : vector<64x64xf32>
    %19 = arith.truncf %18 : vector<64x64xf32> to vector<64x64xbf16>
    %c0_14 = arith.constant 0 : index
    %c0_15 = arith.constant 0 : index
    %20 = vector.load %arg6[%c0_14, %c0_15] : memref<64x128xbf16, #tpu.memory_space<vmem>>, vector<64x128xbf16>
    %cst_16 = arith.constant dense<0.000000e+00> : vector<64x128xf32>
    %21 = tpu.matmul %19, %20, %cst_16 {dimension_numbers = #tpu.dot_dimension_numbers<[1], [0], [0], [1], [0, 0, 1, 1], [], []>} : vector<64x64xbf16>, vector<64x128xbf16>, vector<64x128xf32> -> vector<64x128xf32>
    %c0_17 = arith.constant 0 : index
    %c0_18 = arith.constant 0 : index
    %22 = vector.load %arg7[%c0_17, %c0_18] : memref<1x128xf32, #tpu.memory_space<vmem>>, vector<1x128xf32>
    %23 = vector.broadcast %22 : vector<1x128xf32> to vector<64x128xf32>
    %24 = arith.addf %21, %23 : vector<64x128xf32>
    %cst_19 = arith.constant 0.000000e+00 : f32
    %25 = vector.broadcast %cst_19 : f32 to vector<64x128xf32>
    %26 = arith.maximumf %24, %25 : vector<64x128xf32>
    %27 = arith.truncf %26 : vector<64x128xf32> to vector<64x128xbf16>
    %c0_20 = arith.constant 0 : index
    %c0_21 = arith.constant 0 : index
    %28 = vector.load %arg8[%c0_20, %c0_21] : memref<128x16xbf16, #tpu.memory_space<vmem>>, vector<128x16xbf16>
    %cst_22 = arith.constant dense<0.000000e+00> : vector<64x16xf32>
    %29 = tpu.matmul %27, %28, %cst_22 {dimension_numbers = #tpu.dot_dimension_numbers<[1], [0], [0], [1], [0, 0, 1, 1], [], []>} : vector<64x128xbf16>, vector<128x16xbf16>, vector<64x16xf32> -> vector<64x16xf32>
    %c0_23 = arith.constant 0 : index
    %c0_24 = arith.constant 0 : index
    %30 = vector.load %arg9[%c0_23, %c0_24] : memref<1x16xf32, #tpu.memory_space<vmem>>, vector<1x16xf32>
    %31 = vector.broadcast %30 : vector<1x16xf32> to vector<64x16xf32>
    %32 = arith.addf %29, %31 : vector<64x16xf32>
    %33 = arith.truncf %32 : vector<64x16xf32> to vector<64x16xbf16>
    %c0_25 = arith.constant 0 : index
    %c0_26 = arith.constant 0 : index
    %34 = vector.load %arg10[%c0_25, %c0_26] : memref<16x136xbf16, #tpu.memory_space<vmem>>, vector<16x136xbf16>
    %cst_27 = arith.constant dense<0.000000e+00> : vector<64x136xf32>
    %35 = tpu.matmul %33, %34, %cst_27 {dimension_numbers = #tpu.dot_dimension_numbers<[1], [0], [0], [1], [0, 0, 1, 1], [], []>} : vector<64x16xbf16>, vector<16x136xbf16>, vector<64x136xf32> -> vector<64x136xf32>
    %36 = vector.extract_strided_slice %35 {offsets = [0, 0], sizes = [64, 128], strides = [1, 1]} : vector<64x136xf32> to vector<64x128xf32>
    %c0_28 = arith.constant 0 : index
    %c0_29 = arith.constant 0 : index
    %37 = vector.load %arg11[%c0_28, %c0_29] : memref<1x128xf32, #tpu.memory_space<vmem>>, vector<1x128xf32>
    %38 = vector.broadcast %37 : vector<1x128xf32> to vector<64x128xf32>
    %39 = arith.addf %36, %38 : vector<64x128xf32>
    %cst_30 = arith.constant 0.000000e+00 : f32
    %40 = vector.broadcast %cst_30 : f32 to vector<64x128xf32>
    %41 = arith.maximumf %39, %40 : vector<64x128xf32>
    %42 = vector.extract_strided_slice %35 {offsets = [0, 128], sizes = [64, 8], strides = [1, 1]} : vector<64x136xf32> to vector<64x8xf32>
    %43 = arith.truncf %41 : vector<64x128xf32> to vector<64x128xbf16>
    %c0_31 = arith.constant 0 : index
    %c0_32 = arith.constant 0 : index
    %44 = vector.load %arg12[%c0_31, %c0_32] : memref<128x64xbf16, #tpu.memory_space<vmem>>, vector<128x64xbf16>
    %cst_33 = arith.constant dense<0.000000e+00> : vector<64x64xf32>
    %45 = tpu.matmul %43, %44, %cst_33 {dimension_numbers = #tpu.dot_dimension_numbers<[1], [0], [0], [1], [0, 0, 1, 1], [], []>} : vector<64x128xbf16>, vector<128x64xbf16>, vector<64x64xf32> -> vector<64x64xf32>
    %c0_34 = arith.constant 0 : index
    %c0_35 = arith.constant 0 : index
    %46 = vector.load %arg13[%c0_34, %c0_35] : memref<1x64xf32, #tpu.memory_space<vmem>>, vector<1x64xf32>
    %47 = vector.broadcast %46 : vector<1x64xf32> to vector<64x64xf32>
    %48 = arith.addf %45, %47 : vector<64x64xf32>
    %cst_36 = arith.constant 0.000000e+00 : f32
    %49 = vector.broadcast %cst_36 : f32 to vector<64x64xf32>
    %50 = arith.maximumf %48, %49 : vector<64x64xf32>
    %51 = arith.truncf %50 : vector<64x64xf32> to vector<64x64xbf16>
    %c0_37 = arith.constant 0 : index
    %c0_38 = arith.constant 0 : index
    %52 = vector.load %arg14[%c0_37, %c0_38] : memref<64x64xbf16, #tpu.memory_space<vmem>>, vector<64x64xbf16>
    %cst_39 = arith.constant dense<0.000000e+00> : vector<64x64xf32>
    %53 = tpu.matmul %51, %52, %cst_39 {dimension_numbers = #tpu.dot_dimension_numbers<[1], [0], [0], [1], [0, 0, 1, 1], [], []>} : vector<64x64xbf16>, vector<64x64xbf16>, vector<64x64xf32> -> vector<64x64xf32>
    %c0_40 = arith.constant 0 : index
    %c0_41 = arith.constant 0 : index
    %54 = vector.load %arg15[%c0_40, %c0_41] : memref<1x64xf32, #tpu.memory_space<vmem>>, vector<1x64xf32>
    %55 = vector.broadcast %54 : vector<1x64xf32> to vector<64x64xf32>
    %56 = arith.addf %53, %55 : vector<64x64xf32>
    %cst_42 = arith.constant 0.000000e+00 : f32
    %57 = vector.broadcast %cst_42 : f32 to vector<64x64xf32>
    %58 = arith.maximumf %56, %57 : vector<64x64xf32>
    %59 = arith.truncf %58 : vector<64x64xf32> to vector<64x64xbf16>
    %c0_43 = arith.constant 0 : index
    %c0_44 = arith.constant 0 : index
    %60 = vector.load %arg16[%c0_43, %c0_44] : memref<64x128xbf16, #tpu.memory_space<vmem>>, vector<64x128xbf16>
    %cst_45 = arith.constant dense<0.000000e+00> : vector<64x128xf32>
    %61 = tpu.matmul %59, %60, %cst_45 {dimension_numbers = #tpu.dot_dimension_numbers<[1], [0], [0], [1], [0, 0, 1, 1], [], []>} : vector<64x64xbf16>, vector<64x128xbf16>, vector<64x128xf32> -> vector<64x128xf32>
    %c0_46 = arith.constant 0 : index
    %c0_47 = arith.constant 0 : index
    %62 = vector.load %arg17[%c0_46, %c0_47] : memref<1x128xf32, #tpu.memory_space<vmem>>, vector<1x128xf32>
    %63 = vector.broadcast %62 : vector<1x128xf32> to vector<64x128xf32>
    %64 = arith.addf %61, %63 : vector<64x128xf32>
    %65 = arith.truncf %10 : vector<64x64xf32> to vector<64x64xbf16>
    %cst_48 = arith.constant dense<0.000000e+00> : vector<64x64xf32>
    %66 = tpu.matmul %1, %65, %cst_48 {dimension_numbers = #tpu.dot_dimension_numbers<[1], [0], [0], [1], [0, 0, 1, 1], [], []>} : vector<64x64xbf16>, vector<64x64xbf16>, vector<64x64xf32> -> vector<64x64xf32>
    %cst_49 = arith.constant 0.000000e+00 : f32
    %67 = vector.broadcast %cst_49 : f32 to vector<64x64xf32>
    %68 = arith.maximumf %66, %67 : vector<64x64xf32>
    %cst_50 = arith.constant 5.000000e-01 : f32
    %69 = vector.broadcast %cst_50 : f32 to vector<64x64xf32>
    %70 = arith.mulf %69, %68 : vector<64x64xf32>
    %cst_51 = arith.constant 5.000000e-01 : f32
    %71 = vector.broadcast %cst_51 : f32 to vector<64x64xf32>
    %72 = arith.mulf %71, %9 : vector<64x64xf32>
    %73 = arith.addf %70, %72 : vector<64x64xf32>
    %74 = arith.truncf %73 : vector<64x64xf32> to vector<64x64xbf16>
    %c0_52 = arith.constant 0 : index
    %c0_53 = arith.constant 0 : index
    %75 = vector.load %arg18[%c0_52, %c0_53] : memref<64x64xbf16, #tpu.memory_space<vmem>>, vector<64x64xbf16>
    %cst_54 = arith.constant dense<0.000000e+00> : vector<64x64xf32>
    %76 = tpu.matmul %74, %75, %cst_54 {dimension_numbers = #tpu.dot_dimension_numbers<[1], [0], [0], [1], [0, 0, 1, 1], [], []>} : vector<64x64xbf16>, vector<64x64xbf16>, vector<64x64xf32> -> vector<64x64xf32>
    %77 = arith.truncf %76 : vector<64x64xf32> to vector<64x64xbf16>
    %cst_55 = arith.constant dense<0.000000e+00> : vector<64x64xf32>
    %78 = tpu.matmul %1, %77, %cst_55 {dimension_numbers = #tpu.dot_dimension_numbers<[1], [0], [0], [1], [0, 0, 1, 1], [], []>} : vector<64x64xbf16>, vector<64x64xbf16>, vector<64x64xf32> -> vector<64x64xf32>
    %cst_56 = arith.constant 0.000000e+00 : f32
    %79 = vector.broadcast %cst_56 : f32 to vector<64x64xf32>
    %80 = arith.maximumf %78, %79 : vector<64x64xf32>
    %cst_57 = arith.constant 5.000000e-01 : f32
    %81 = vector.broadcast %cst_57 : f32 to vector<64x64xf32>
    %82 = arith.mulf %81, %80 : vector<64x64xf32>
    %cst_58 = arith.constant 5.000000e-01 : f32
    %83 = vector.broadcast %cst_58 : f32 to vector<64x64xf32>
    %84 = arith.mulf %83, %18 : vector<64x64xf32>
    %85 = arith.addf %82, %84 : vector<64x64xf32>
    %86 = arith.truncf %85 : vector<64x64xf32> to vector<64x64xbf16>
    %c0_59 = arith.constant 0 : index
    %c0_60 = arith.constant 0 : index
    %87 = vector.load %arg19[%c0_59, %c0_60] : memref<64x128xbf16, #tpu.memory_space<vmem>>, vector<64x128xbf16>
    %cst_61 = arith.constant dense<0.000000e+00> : vector<64x128xf32>
    %88 = tpu.matmul %86, %87, %cst_61 {dimension_numbers = #tpu.dot_dimension_numbers<[1], [0], [0], [1], [0, 0, 1, 1], [], []>} : vector<64x64xbf16>, vector<64x128xbf16>, vector<64x128xf32> -> vector<64x128xf32>
    %89 = arith.truncf %88 : vector<64x128xf32> to vector<64x128xbf16>
    %cst_62 = arith.constant dense<0.000000e+00> : vector<64x128xf32>
    %90 = tpu.matmul %1, %89, %cst_62 {dimension_numbers = #tpu.dot_dimension_numbers<[1], [0], [0], [1], [0, 0, 1, 1], [], []>} : vector<64x64xbf16>, vector<64x128xbf16>, vector<64x128xf32> -> vector<64x128xf32>
    %cst_63 = arith.constant 0.000000e+00 : f32
    %91 = vector.broadcast %cst_63 : f32 to vector<64x128xf32>
    %92 = arith.maximumf %90, %91 : vector<64x128xf32>
    %cst_64 = arith.constant 5.000000e-01 : f32
    %93 = vector.broadcast %cst_64 : f32 to vector<64x128xf32>
    %94 = arith.mulf %93, %92 : vector<64x128xf32>
    %cst_65 = arith.constant 5.000000e-01 : f32
    %95 = vector.broadcast %cst_65 : f32 to vector<64x128xf32>
    %96 = arith.mulf %95, %26 : vector<64x128xf32>
    %97 = arith.addf %94, %96 : vector<64x128xf32>
    %98 = arith.truncf %97 : vector<64x128xf32> to vector<64x128xbf16>
    %c0_66 = arith.constant 0 : index
    %c0_67 = arith.constant 0 : index
    %99 = vector.load %arg20[%c0_66, %c0_67] : memref<128x16xbf16, #tpu.memory_space<vmem>>, vector<128x16xbf16>
    %cst_68 = arith.constant dense<0.000000e+00> : vector<64x16xf32>
    %100 = tpu.matmul %98, %99, %cst_68 {dimension_numbers = #tpu.dot_dimension_numbers<[1], [0], [0], [1], [0, 0, 1, 1], [], []>} : vector<64x128xbf16>, vector<128x16xbf16>, vector<64x16xf32> -> vector<64x16xf32>
    %101 = arith.truncf %100 : vector<64x16xf32> to vector<64x16xbf16>
    %cst_69 = arith.constant dense<0.000000e+00> : vector<64x16xf32>
    %102 = tpu.matmul %1, %101, %cst_69 {dimension_numbers = #tpu.dot_dimension_numbers<[1], [0], [0], [1], [0, 0, 1, 1], [], []>} : vector<64x64xbf16>, vector<64x16xbf16>, vector<64x16xf32> -> vector<64x16xf32>
    %cst_70 = arith.constant 0.000000e+00 : f32
    %103 = vector.broadcast %cst_70 : f32 to vector<64x16xf32>
    %104 = arith.maximumf %102, %103 : vector<64x16xf32>
    %cst_71 = arith.constant 5.000000e-01 : f32
    %105 = vector.broadcast %cst_71 : f32 to vector<64x16xf32>
    %106 = arith.mulf %105, %104 : vector<64x16xf32>
    %cst_72 = arith.constant 5.000000e-01 : f32
    %107 = vector.broadcast %cst_72 : f32 to vector<64x16xf32>
    %108 = arith.mulf %107, %32 : vector<64x16xf32>
    %109 = arith.addf %106, %108 : vector<64x16xf32>
    %110 = arith.truncf %109 : vector<64x16xf32> to vector<64x16xbf16>
    %c0_73 = arith.constant 0 : index
    %c0_74 = arith.constant 0 : index
    %111 = vector.load %arg21[%c0_73, %c0_74] : memref<16x8xbf16, #tpu.memory_space<vmem>>, vector<16x8xbf16>
    %cst_75 = arith.constant dense<0.000000e+00> : vector<64x8xf32>
    %112 = tpu.matmul %110, %111, %cst_75 {dimension_numbers = #tpu.dot_dimension_numbers<[1], [0], [0], [1], [0, 0, 1, 1], [], []>} : vector<64x16xbf16>, vector<16x8xbf16>, vector<64x8xf32> -> vector<64x8xf32>
    %113 = arith.truncf %112 : vector<64x8xf32> to vector<64x8xbf16>
    %cst_76 = arith.constant dense<0.000000e+00> : vector<64x8xf32>
    %114 = tpu.matmul %1, %113, %cst_76 {dimension_numbers = #tpu.dot_dimension_numbers<[1], [0], [0], [1], [0, 0, 1, 1], [], []>} : vector<64x64xbf16>, vector<64x8xbf16>, vector<64x8xf32> -> vector<64x8xf32>
    %cst_77 = arith.constant dense<0xFF800000> : vector<64xf32>
    %115 = vector.multi_reduction <maximumf>, %114, %cst_77 [1] : vector<64x8xf32> to vector<64xf32>
    %116 = vector.shape_cast %115 : vector<64xf32> to vector<64x1xf32>
    %117 = vector.broadcast %116 : vector<64x1xf32> to vector<64x8xf32>
    %118 = arith.subf %114, %117 : vector<64x8xf32>
    %119 = math.exp %118 : vector<64x8xf32>
    %cst_78 = arith.constant dense<0.000000e+00> : vector<64xf32>
    %120 = vector.multi_reduction <add>, %119, %cst_78 [1] : vector<64x8xf32> to vector<64xf32>
    %121 = vector.shape_cast %120 : vector<64xf32> to vector<64x1xf32>
    %122 = tpu.reciprocal %121 {approx = true} : vector<64x1xf32> -> vector<64x1xf32>
    %123 = vector.broadcast %122 : vector<64x1xf32> to vector<64x8xf32>
    %124 = arith.mulf %119, %123 : vector<64x8xf32>
    %125 = arith.mulf %32, %32 : vector<64x16xf32>
    %cst_79 = arith.constant dense<0.000000e+00> : vector<64xf32>
    %126 = vector.multi_reduction <add>, %125, %cst_79 [1] : vector<64x16xf32> to vector<64xf32>
    %127 = vector.shape_cast %126 : vector<64xf32> to vector<64x1xf32>
    %c0_80 = arith.constant 0 : index
    %c0_81 = arith.constant 0 : index
    %128 = vector.load %arg22[%c0_80, %c0_81] : memref<1x8xf32, #tpu.memory_space<vmem>>, vector<1x8xf32>
    %129 = vector.broadcast %127 : vector<64x1xf32> to vector<64x8xf32>
    %130 = vector.broadcast %128 : vector<1x8xf32> to vector<64x8xf32>
    %131 = arith.addf %129, %130 : vector<64x8xf32>
    %cst_82 = arith.constant 2.000000e+00 : f32
    %132 = vector.broadcast %cst_82 : f32 to vector<64x8xf32>
    %133 = arith.mulf %132, %42 : vector<64x8xf32>
    %134 = arith.subf %131, %133 : vector<64x8xf32>
    %cst_83 = arith.constant 0.000000e+00 : f32
    %135 = vector.broadcast %cst_83 : f32 to vector<64x8xf32>
    %136 = arith.maximumf %134, %135 : vector<64x8xf32>
    %cst_84 = arith.constant 1.000000e+00 : f32
    %137 = vector.broadcast %cst_84 : f32 to vector<64x8xf32>
    %138 = arith.mulf %136, %137 : vector<64x8xf32>
    %cst_85 = arith.constant 1.000000e+00 : f32
    %139 = vector.broadcast %cst_85 : f32 to vector<64x8xf32>
    %140 = arith.addf %139, %138 : vector<64x8xf32>
    %cst_86 = arith.constant 1.000000e+00 : f32
    %141 = vector.broadcast %cst_86 : f32 to vector<64x8xf32>
    %142 = arith.divf %141, %140 : vector<64x8xf32>
    %cst_87 = arith.constant dense<0.000000e+00> : vector<64xf32>
    %143 = vector.multi_reduction <add>, %142, %cst_87 [1] : vector<64x8xf32> to vector<64xf32>
    %144 = vector.shape_cast %143 : vector<64xf32> to vector<64x1xf32>
    %145 = tpu.reciprocal %144 {approx = true} : vector<64x1xf32> -> vector<64x1xf32>
    %146 = vector.broadcast %145 : vector<64x1xf32> to vector<64x8xf32>
    %147 = arith.mulf %142, %146 : vector<64x8xf32>
    %c0_88 = arith.constant 0 : index
    %c0_89 = arith.constant 0 : index
    %148 = vector.load %arg23[%c0_88, %c0_89] : memref<64x128xf32, #tpu.memory_space<vmem>>, vector<64x128xf32>
    tpu.vector_store %arg23[%c0_88, %c0_89], %64 {strides = array<i32>} : memref<64x128xf32, #tpu.memory_space<vmem>>, vector<64x128xf32>,
    %cst_90 = arith.constant 0.000000e+00 : f32
    %149 = vector.broadcast %cst_90 : f32 to vector<64x96xf32>
    %150 = tpu.concatenate %147, %124, %32, %149 in 1 : vector<64x8xf32>, vector<64x8xf32>, vector<64x16xf32>, vector<64x96xf32> -> vector<64x128xf32>
    %c0_91 = arith.constant 0 : index
    %c0_92 = arith.constant 0 : index
    %151 = vector.load %arg24[%c0_91, %c0_92] : memref<64x128xf32, #tpu.memory_space<vmem>>, vector<64x128xf32>
    tpu.vector_store %arg24[%c0_91, %c0_92], %150 {strides = array<i32>} : memref<64x128xf32, #tpu.memory_space<vmem>>, vector<64x128xf32>,
    return
  }
}

</mosaic_0001>

<bundles_post_ra>
// kernel: _sdcn_forward_impl.1
= control target key start
LH: loop header
LB: loop body
LE: loop exit
PB: predicated region body
PF: predicated region fallthrough
CT: control target
= control target key end

     0   :  { %s4643_s0 = inlined_call_operand.vmem [shape: bf16[64,128], index: 0, kind: input, shape index: {}]   ;;  %s4644_s1 = inlined_call_operand.vmem [shape: bf16[64,64], index: 1, kind: input, shape index: {}]   ;;  %s4645_s2 = inlined_call_operand.vmem [shape: bf16[128,128], index: 2, kind: input, shape index: {}]   ;;  %s4646_s3 = inlined_call_operand.hbm [shape: f32[1,64], index: 3, kind: input, shape index: {}]   ;;  %s4647_s4 = inlined_call_operand.vmem [shape: bf16[64,64], index: 4, kind: input, shape index: {}]   ;;  %s4648_s5 = inlined_call_operand.hbm [shape: f32[1,64], index: 5, kind: input, shape index: {}]   ;;  %s4649_s6 = inlined_call_operand.vmem [shape: bf16[64,128], index: 6, kind: input, shape index: {}]   ;;  %s4650_s7 = inlined_call_operand.hbm [shape: f32[1,128], index: 7, kind: input, shape index: {}]   ;;  %s4651_s8 = inlined_call_operand.vmem [shape: bf16[128,16], index: 8, kind: input, shape index: {}]   ;;  %s4652_s9 = inlined_call_operand.hbm [shape: f32[1,16], index: 9, kind: input, shape index: {}]   ;;  %s4653_s10 = inlined_call_operand.hbm [shape: bf16[16,136], index: 10, kind: input, shape index: {}]   ;;  %s4654_s11 = inlined_call_operand.hbm [shape: f32[1,128], index: 11, kind: input, shape index: {}]   ;;  %s4655_s12 = inlined_call_operand.vmem [shape: bf16[128,64], index: 12, kind: input, shape index: {}]   ;;  %s4656_s13 = inlined_call_operand.hbm [shape: f32[1,64], index: 13, kind: input, shape index: {}]   ;;  %s4657_s14 = inlined_call_operand.vmem [shape: bf16[64,64], index: 14, kind: input, shape index: {}]   ;;  %s4658_s15 = inlined_call_operand.hbm [shape: f32[1,64], index: 15, kind: input, shape index: {}]   ;;  %s4659_s16 = inlined_call_operand.vmem [shape: bf16[64,128], index: 16, kind: input, shape index: {}]   ;;  %s4660_s17 = inlined_call_operand.hbm [shape: f32[1,128], index: 17, kind: input, shape index: {}]   ;;  %s4661_s18 = inlined_call_operand.hbm [shape: bf16[64,64], index: 18, kind: input, shape index: {}]   ;;  %s4662_s19 = inlined_call_operand.vmem [shape: bf16[64,128], index: 19, kind: input, shape index: {}]   ;;  %s4663_s20 = inlined_call_operand.vmem [shape: bf16[128,16], index: 20, kind: input, shape index: {}]   ;;  %s4664_s21 = inlined_call_operand.vmem [shape: bf16[16,8], index: 21, kind: input, shape index: {}]   ;;  %s4665_s22 = inlined_call_operand.hbm [shape: f32[1,8], index: 22, kind: input, shape index: {}]   ;;  %s4666_s23 = inlined_call_operand.hbm [shape: f32[64,128], index: 23, kind: output, shape index: {0}]   ;;  %s4667_s24 = inlined_call_operand.vmem [shape: f32[64,128], index: 24, kind: output, shape index: {1}]  }
   0x1   :  { %4701 = sst [smem:[#allocation29_spill]] %s4643_s0 }
   0x2   :  { %4702 = sst [smem:[#allocation30_spill]] %s4644_s1 }
   0x3   :  { %4703 = sst [smem:[#allocation31_spill]] %s4645_s2 }
   0x4   :  { %4704 = sst [smem:[#allocation32_spill]] %s4646_s3 }
   0x5   :  { %4705 = sst [smem:[#allocation33_spill]] %s4647_s4 }
   0x6   :  { %4706 = sst [smem:[#allocation34_spill]] %s4648_s5 }
   0x7   :  { %4707 = sst [smem:[#allocation35_spill]] %s4649_s6 }
   0x8   :  { %4708 = sst [smem:[#allocation36_spill]] %s4650_s7 }
   0x9   :  { %4709 = sst [smem:[#allocation37_spill]] %s4651_s8 }
   0xa   :  { %30 = vsyncpa [#allocation3], 0 }
   0xb   :  { %31 = vsyncpa [#allocation6], 0 }
   0xc   :  { %32 = vsyncpa [#allocation9], 0 }
   0xd   :  { %33 = vsyncpa [#allocation12], 0 }
   0xe   :  { %34 = vsyncpa [#allocation15], 0 }
   0xf   :  { %35 = vsyncpa [#allocation18], 0 }
  0x10   :  { %36 = vsyncpa [#allocation4], 0  ;;  %s3630_s5 = smov [#allocation5]   ;;  %s3631_s27 = smov [#allocation8]  }
  0x11   :  { %s61_s26 = sshll.u32 %s3630_s5, 4  ;;  %s85_s28 = sshll.u32 %s3631_s27, 4  ;;  %s62_s26 = int_to_ptr.vmem [resolvable:$true] %s61_s26  ;;  %s86_s28 = int_to_ptr.vmem [resolvable:$true] %s85_s28 }
  0x12   :  { %s4710_s29 = sld [smem:[#allocation34_spill]] }
  0x18   :  { %s3352_s0 = scalar_lea.hbm %s4710_s29, 16 }
  0x19   :  { %p3353_p0 = scmp.ne.s32.totalorder %s4710_s29, %s3352_s0  ;;  %p3356_p1 = scmp.lt.u32.totalorder %s3352_s0, %s4710_s29 }
  0x1b   :  { %p3358_p2 = pnand %p3356_p1, %p3353_p0 }
  0x1d   :  { %3361 = shalt.err (!%p3358_p2)
}
  0x1e   :  { %s3362_s8 = scalar_lea.vmem %s62_s26, 16  ;;  %s3366_s4 = scalar_lea.vmem %s62_s26, 32 }
  0x1f   :  { %p3363_p3 = scmp.ne.s32.totalorder %s62_s26, %s3362_s8  ;;  %p3367_p4 = scmp.lt.s32.totalorder %s62_s26, %s62_s26 }
  0x20   :  { %p3368_p5 = scmp.lt.s32.totalorder %s3366_s4, %s3362_s8 }
  0x22   :  { %p3369_p6 = por %p3368_p5, %p3367_p4 }
  0x24   :  { %p3370_p7 = pnand %p3369_p6, %p3363_p3 }
  0x26   :  { %3373 = shalt.err (!%p3370_p7)
}
  0x27   :  { %64 = dma.hbm_to_vmem [thread:$0]  %s4710_s29, 16, %s62_s26, [#allocation6]  }
  0x28   :  { %s3374_s2 = scalar_lea.hbm %s4652_s9, 16 }
  0x29   :  { %p3375_p8 = scmp.ne.s32.totalorder %s4652_s9, %s3374_s2  ;;  %p3378_p9 = scmp.lt.u32.totalorder %s3374_s2, %s4652_s9 }
  0x2b   :  { %p3380_p10 = pnand %p3378_p9, %p3375_p8 }
  0x2d   :  { %3383 = shalt.err (!%p3380_p10)
}
  0x2e   :  { %s3384_s25 = scalar_lea.vmem %s86_s28, 16  ;;  %s3388_s8 = scalar_lea.vmem %s86_s28, 32 }
  0x2f   :  { %p3385_p11 = scmp.ne.s32.totalorder %s86_s28, %s3384_s25  ;;  %p3389_p12 = scmp.lt.s32.totalorder %s86_s28, %s86_s28 }
  0x30   :  { %p3390_p13 = scmp.lt.s32.totalorder %s3388_s8, %s3384_s25 }
  0x32   :  { %p3391_p0 = por %p3390_p13, %p3389_p12 }
  0x34   :  { %p3392_p1 = pnand %p3391_p0, %p3385_p11 }
  0x36   :  { %3395 = shalt.err (!%p3392_p1)
}
  0x37   :  { %88 = dma.hbm_to_vmem [thread:$0]  %s4652_s9, 16, %s86_s28, [#allocation9]  }
  0x38   :  { %s3632_s4 = smov [#allocation11]   ;;  %s3633_s5 = smov [#allocation14]  }
  0x39   :  { %s107_s1 = sshll.u32 %s3632_s4, 4  ;;  %s131_s27 = sshll.u32 %s3633_s5, 4  ;;  %s108_s1 = int_to_ptr.vmem [resolvable:$true] %s107_s1  ;;  %s132_s27 = int_to_ptr.vmem [resolvable:$true] %s131_s27 }
  0x3a   :  { %s3396_s7 = scalar_lea.hbm %s4654_s11, 16 }
  0x3b   :  { %p3397_p2 = scmp.ne.s32.totalorder %s4654_s11, %s3396_s7  ;;  %p3400_p3 = scmp.lt.u32.totalorder %s3396_s7, %s4654_s11 }
  0x3d   :  { %p3402_p4 = pnand %p3400_p3, %p3397_p2 }
  0x3f   :  { %3405 = shalt.err (!%p3402_p4)
}
  0x40   :  { %s3406_s9 = scalar_lea.vmem %s108_s1, 16  ;;  %s3410_s28 = scalar_lea.vmem %s108_s1, 32 }
  0x41   :  { %p3407_p5 = scmp.ne.s32.totalorder %s108_s1, %s3406_s9  ;;  %p3411_p6 = scmp.lt.s32.totalorder %s108_s1, %s108_s1 }
  0x42   :  { %p3412_p7 = scmp.lt.s32.totalorder %s3410_s28, %s3406_s9 }
  0x44   :  { %p3413_p8 = por %p3412_p7, %p3411_p6 }
  0x46   :  { %p3414_p9 = pnand %p3413_p8, %p3407_p5 }
  0x48   :  { %3417 = shalt.err (!%p3414_p9)
}
  0x49   :  { %110 = dma.hbm_to_vmem [thread:$0]  %s4654_s11, 16, %s108_s1, [#allocation12]  }
  0x4a   :  { %s3418_s5 = scalar_lea.hbm %s4658_s15, 16 }
  0x4b   :  { %p3419_p10 = scmp.ne.s32.totalorder %s4658_s15, %s3418_s5  ;;  %p3422_p11 = scmp.lt.u32.totalorder %s3418_s5, %s4658_s15 }
  0x4d   :  { %p3424_p12 = pnand %p3422_p11, %p3419_p10 }
  0x4f   :  { %3427 = shalt.err (!%p3424_p12)
}
  0x50   :  { %s3428_s30 = scalar_lea.vmem %s132_s27, 16  ;;  %s3432_s3 = scalar_lea.vmem %s132_s27, 32 }
  0x51   :  { %p3429_p13 = scmp.ne.s32.totalorder %s132_s27, %s3428_s30  ;;  %p3433_p0 = scmp.lt.s32.totalorder %s132_s27, %s132_s27 }
  0x52   :  { %p3434_p1 = scmp.lt.s32.totalorder %s3432_s3, %s3428_s30 }
  0x54   :  { %p3435_p2 = por %p3434_p1, %p3433_p0 }
  0x56   :  { %p3436_p3 = pnand %p3435_p2, %p3429_p13 }
  0x58   :  { %3439 = shalt.err (!%p3436_p3)
}
  0x59   :  { %134 = dma.hbm_to_vmem [thread:$0]  %s4658_s15, 16, %s132_s27, [#allocation15]  }
  0x5a   :  { %s3634_s25 = smov [#allocation17]   ;;  %s3440_s26 = scalar_lea.hbm %s4661_s18, 512 }
  0x5b   :  { %s152_s9 = sshll.u32 %s3634_s25, 4  ;;  %p3441_p4 = scmp.ne.s32.totalorder %s4661_s18, %s3440_s26  ;;  %s153_s9 = int_to_ptr.vmem [resolvable:$true] %s152_s9 }
  0x5c   :  { %p3444_p5 = scmp.lt.u32.totalorder %s3440_s26, %s4661_s18 }
  0x5e   :  { %p3446_p6 = pnand %p3444_p5, %p3441_p4 }
  0x60   :  { %3449 = shalt.err (!%p3446_p6)
}
  0x61   :  { %s3450_s2 = scalar_lea.vmem %s153_s9, 512  ;;  %p3455_p8 = scmp.lt.s32.totalorder %s153_s9, %s153_s9 }
  0x62   :  { %p3451_p7 = scmp.ne.s32.totalorder %s153_s9, %s3450_s2  ;;  %p3456_p9 = scmp.lt.s32.totalorder %s3450_s2, %s3450_s2 }
  0x64   :  { %p3457_p10 = por %p3456_p9, %p3455_p8 }
  0x66   :  { %p3458_p11 = pnand %p3457_p10, %p3451_p7 }
  0x68   :  { %3461 = shalt.err (!%p3458_p11)
}
  0x69   :  { %s3635_s15 = smov 64   ;;  %s3636_s27 = smov 4  }
  0x6a   :  { %158 = dma.hbm_to_vmem [thread:$0]  %s4661_s18, 512, %s153_s9, [#allocation18], %s3635_s15, %s3635_s15, %s3636_s27  }
  0x6b   :  { %s3637_s30 = smov [#allocation2]   ;;  %s3638_s11 = smov [#allocation7]  }
  0x6c   :  { %s49_s3 = sshll.u32 %s3637_s30, 4  ;;  %s73_s1 = sshll.u32 %s3638_s11, 4  ;;  %s50_s3 = int_to_ptr.vmem [resolvable:$true] %s49_s3  ;;  %s74_s1 = int_to_ptr.vmem [resolvable:$true] %s73_s1 }
  0x6d   :  { %s4711_s8 = sld [smem:[#allocation32_spill]] }
  0x73   :  { %s3462_s26 = scalar_lea.hbm %s4711_s8, 16 }
  0x74   :  { %p3463_p12 = scmp.ne.s32.totalorder %s4711_s8, %s3462_s26  ;;  %p3466_p13 = scmp.lt.u32.totalorder %s3462_s26, %s4711_s8 }
  0x76   :  { %p3468_p0 = pnand %p3466_p13, %p3463_p12 }
  0x78   :  { %3471 = shalt.err (!%p3468_p0)
}
  0x79   :  { %s3472_s18 = scalar_lea.vmem %s50_s3, 16  ;;  %s3476_s9 = scalar_lea.vmem %s50_s3, 32 }
  0x7a   :  { %p3473_p1 = scmp.ne.s32.totalorder %s50_s3, %s3472_s18  ;;  %p3477_p2 = scmp.lt.s32.totalorder %s50_s3, %s50_s3 }
  0x7b   :  { %p3478_p3 = scmp.lt.s32.totalorder %s3476_s9, %s3472_s18 }
  0x7d   :  { %p3479_p4 = por %p3478_p3, %p3477_p2 }
  0x7f   :  { %p3480_p5 = pnand %p3479_p4, %p3473_p1 }
  0x81   :  { %3483 = shalt.err (!%p3480_p5)
}
  0x82   :  { %52 = dma.hbm_to_vmem [thread:$0]  %s4711_s8, 16, %s50_s3, [#allocation3]  }
  0x83   :  { %s4712_s30 = sld [smem:[#allocation36_spill]] }
  0x89   :  { %s3484_s11 = scalar_lea.hbm %s4712_s30, 16 }
  0x8a   :  { %p3485_p6 = scmp.ne.s32.totalorder %s4712_s30, %s3484_s11  ;;  %p3488_p7 = scmp.lt.u32.totalorder %s3484_s11, %s4712_s30 }
  0x8c   :  { %p3490_p8 = pnand %p3488_p7, %p3485_p6 }
  0x8e   :  { %3493 = shalt.err (!%p3490_p8)
}
  0x8f   :  { %s3494_s4 = scalar_lea.vmem %s74_s1, 16  ;;  %s3498_s5 = scalar_lea.vmem %s74_s1, 32 }
  0x90   :  { %p3495_p9 = scmp.ne.s32.totalorder %s74_s1, %s3494_s4  ;;  %p3499_p10 = scmp.lt.s32.totalorder %s74_s1, %s74_s1 }
  0x91   :  { %p3500_p11 = scmp.lt.s32.totalorder %s3498_s5, %s3494_s4 }
  0x93   :  { %p3501_p12 = por %p3500_p11, %p3499_p10 }
  0x95   :  { %p3502_p13 = pnand %p3501_p12, %p3495_p9 }
  0x97   :  { %3505 = shalt.err (!%p3502_p13)
}
  0x98   :  { %76 = dma.hbm_to_vmem [thread:$0]  %s4712_s30, 16, %s74_s1, [#allocation6]  }
  0x99   :  { %s3639_s6 = smov [#allocation10]   ;;  %s3506_s27 = scalar_lea.hbm %s4653_s10, 256 }
  0x9a   :  { %s94_s18 = sshll.u32 %s3639_s6, 4  ;;  %p3507_p0 = scmp.ne.s32.totalorder %s4653_s10, %s3506_s27  ;;  %s95_s18 = int_to_ptr.vmem [resolvable:$true] %s94_s18 }
  0x9b   :  { %p3510_p1 = scmp.lt.u32.totalorder %s3506_s27, %s4653_s10 }
  0x9d   :  { %p3512_p2 = pnand %p3510_p1, %p3507_p0 }
  0x9f   :  { %3515 = shalt.err (!%p3512_p2)
}
  0xa0   :  { %s3516_s28 = scalar_lea.vmem %s95_s18, 256  ;;  %p3521_p4 = scmp.lt.s32.totalorder %s95_s18, %s95_s18 }
  0xa1   :  { %p3517_p3 = scmp.ne.s32.totalorder %s95_s18, %s3516_s28  ;;  %p3522_p5 = scmp.lt.s32.totalorder %s3516_s28, %s3516_s28 }
  0xa3   :  { %p3523_p6 = por %p3522_p5, %p3521_p4 }
  0xa5   :  { %p3524_p7 = pnand %p3523_p6, %p3517_p3 }
  0xa7   :  { %3527 = shalt.err (!%p3524_p7)
}
  0xa8   :  { %s3640_s1 = smov 128   ;;  %s3641_s30 = smov 8  }
  0xa9   :  { %100 = dma.hbm_to_vmem [thread:$0]  %s4653_s10, 256, %s95_s18, [#allocation9], %s3640_s1, %s3640_s1, %s3641_s30  }
  0xaa   :  { %s3642_s4 = smov [#allocation13]   ;;  %s3643_s3 = smov [#allocation16]  }
  0xab   :  { %s119_s5 = sshll.u32 %s3642_s4, 4  ;;  %s143_s8 = sshll.u32 %s3643_s3, 4  ;;  %s120_s5 = int_to_ptr.vmem [resolvable:$true] %s119_s5  ;;  %s144_s8 = int_to_ptr.vmem [resolvable:$true] %s143_s8 }
  0xac   :  { %s3528_s2 = scalar_lea.hbm %s4656_s13, 16 }
  0xad   :  { %p3529_p8 = scmp.ne.s32.totalorder %s4656_s13, %s3528_s2  ;;  %p3532_p9 = scmp.lt.u32.totalorder %s3528_s2, %s4656_s13 }
  0xaf   :  { %p3534_p10 = pnand %p3532_p9, %p3529_p8 }
  0xb1   :  { %3537 = shalt.err (!%p3534_p10)
}
  0xb2   :  { %s3538_s10 = scalar_lea.vmem %s120_s5, 16  ;;  %s3542_s18 = scalar_lea.vmem %s120_s5, 32 }
  0xb3   :  { %p3539_p11 = scmp.ne.s32.totalorder %s120_s5, %s3538_s10  ;;  %p3543_p12 = scmp.lt.s32.totalorder %s120_s5, %s120_s5 }
  0xb4   :  { %p3544_p13 = scmp.lt.s32.totalorder %s3542_s18, %s3538_s10 }
  0xb6   :  { %p3545_p0 = por %p3544_p13, %p3543_p12 }
  0xb8   :  { %p3546_p1 = pnand %p3545_p0, %p3539_p11 }
  0xba   :  { %3549 = shalt.err (!%p3546_p1)
}
  0xbb   :  { %122 = dma.hbm_to_vmem [thread:$0]  %s4656_s13, 16, %s120_s5, [#allocation12]  }
  0xbc   :  { %s3550_s4 = scalar_lea.hbm %s4660_s17, 16 }
  0xbd   :  { %p3551_p2 = scmp.ne.s32.totalorder %s4660_s17, %s3550_s4  ;;  %p3554_p3 = scmp.lt.u32.totalorder %s3550_s4, %s4660_s17 }
  0xbf   :  { %p3556_p4 = pnand %p3554_p3, %p3551_p2 }
  0xc1   :  { %3559 = shalt.err (!%p3556_p4)
}
  0xc2   :  { %s3560_s27 = scalar_lea.vmem %s144_s8, 16  ;;  %s3564_s7 = scalar_lea.vmem %s144_s8, 32 }
  0xc3   :  { %p3561_p5 = scmp.ne.s32.totalorder %s144_s8, %s3560_s27  ;;  %p3565_p6 = scmp.lt.s32.totalorder %s144_s8, %s144_s8 }
  0xc4   :  { %p3566_p7 = scmp.lt.s32.totalorder %s3564_s7, %s3560_s27 }
  0xc6   :  { %p3567_p8 = por %p3566_p7, %p3565_p6 }
  0xc8   :  { %p3568_p9 = pnand %p3567_p8, %p3561_p5 }
  0xca   :  { %3571 = shalt.err (!%p3568_p9)
}
  0xcb   :  { %146 = dma.hbm_to_vmem [thread:$0]  %s4660_s17, 16, %s144_s8, [#allocation15]  }
  0xcc   :  { %s3644_s0 = smov [#allocation19]   ;;  %s3572_s25 = scalar_lea.hbm %s4665_s22, 16 }
  0xcd   :  { %s171_s11 = sshll.u32 %s3644_s0, 4  ;;  %p3573_p10 = scmp.ne.s32.totalorder %s4665_s22, %s3572_s25  ;;  %s172_s11 = int_to_ptr.vmem [resolvable:$true] %s171_s11 }
  0xce   :  { %p3576_p11 = scmp.lt.u32.totalorder %s3572_s25, %s4665_s22 }
  0xd0   :  { %p3578_p12 = pnand %p3576_p11, %p3573_p10 }
  0xd2   :  { %3581 = shalt.err (!%p3578_p12)
}
  0xd3   :  { %s3582_s3 = scalar_lea.vmem %s172_s11, 16  ;;  %s3586_s17 = scalar_lea.vmem %s172_s11, 32 }
  0xd4   :  { %p3583_p13 = scmp.ne.s32.totalorder %s172_s11, %s3582_s3  ;;  %p3587_p0 = scmp.lt.s32.totalorder %s172_s11, %s172_s11 }
  0xd5   :  { %p3588_p1 = scmp.lt.s32.totalorder %s3586_s17, %s3582_s3 }
  0xd7   :  { %p3589_p2 = por %p3588_p1, %p3587_p0 }
  0xd9   :  { %p3590_p3 = pnand %p3589_p2, %p3583_p13 }
  0xdb   :  { %3593 = shalt.err (!%p3590_p3)
}
  0xdc   :  { %174 = dma.hbm_to_vmem [thread:$0]  %s4665_s22, 16, %s172_s11, [#allocation18]  }
  0xdd   :  { %3616 = dma.done.wait [#allocation3], 16  }
  0xde   :  { %3617 = vsyncadd [#allocation3], 4294967280 }
  0xdf   :  { %3618 = dma.done.wait [#allocation6], 32  }
  0xe0   :  { %3619 = vsyncadd [#allocation6], 4294967264 }
  0xe1   :  { %3620 = dma.done.wait [#allocation9], 272  }
  0xe2   :  { %3621 = vsyncadd [#allocation9], 4294967024 }
  0xe3   :  { %3622 = dma.done.wait [#allocation12], 32  }
  0xe4   :  { %3623 = vsyncadd [#allocation12], 4294967264 }
  0xe5   :  { %3624 = dma.done.wait [#allocation15], 32  }
  0xe6   :  { %3625 = vsyncadd [#allocation15], 4294967264 }
  0xe7   :  { %3626 = dma.done.wait [#allocation18], 528  }
  0xe8   :  { %3627 = vsyncadd [#allocation18], 4294966768  ;;  %s4713_s27 = sld [smem:[#allocation31_spill]]  ;;  %s4714_s25 = sld [smem:[#allocation29_spill]]  ;;  %v2655_v16 = vld [vmem:[#allocation2] ss:$0 sm:$0xff] }
  0xe9   :  { %s4715_s3 = sld [smem:[#allocation33_spill]]  ;;  %vm444_vm0 = vcmask 523264   ;;  %s4717_s0 = sld [smem:[#allocation37_spill]]  ;;  %v2656_v59 = vld [vmem:[#allocation5] ss:$0 sm:$0xff]  ;;  %vm814_vm1 = vcmask 130048  }
  0xea   :  { %s4719_s9 = sld [smem:[#allocation30_spill]]  ;;  %vm2288_vm2 = vcmask 64512  }
  0xee   :  { %v3220_v0 = vld [vmem:[%s4713_s27] sm:$0xff]   ;;  %v3221_v1 = vld [vmem:[%s4713_s27 + $0x8] sm:$0xff]   ;;  %v3222_v2 = vld [vmem:[%s4713_s27 + $0x10] sm:$0xff]  }
  0xef   :  { %2912 = vmatprep.subr.bf16.mxu0 %v3220_v0  ;;  %v3223_v3 = vld [vmem:[%s4713_s27 + $0x18] sm:$0xff]   ;;  %v3228_v4 = vld [vmem:[%s4714_s25] sm:$0xff]   ;;  %v3233_v7 = vld [vmem:[%s4715_s3 + $0x8] sm:$0xff]  }
  0xf0   :  { %2913 = vmatpush3.bf16.msra.mxu0 %v3220_v0  ;;  %2928 = vmatprep.mubr.bf16.mxu0 %v3228_v4  ;;  %v3224_v5 = vld [vmem:[%s4713_s27 + $0x20] sm:$0xff]   ;;  %v3225_v8 = vld [vmem:[%s4713_s27 + $0x28] sm:$0xff]   ;;  %v3226_v9 = vld [vmem:[%s4713_s27 + $0x30] sm:$0xff]  }
  0xf1   :  { %2914 = vmatprep.subr.bf16.mxu0 %v3221_v1  ;;  %v3232_v6 = vld [vmem:[%s4715_s3] sm:$0xff]   ;;  %v3227_v10 = vld [vmem:[%s4713_s27 + $0x38] sm:$0xff]   ;;  %v3229_v11 = vld [vmem:[%s4714_s25 + $0x8] sm:$0xff]  }
  0xf2   :  { %2936 = vmatprep.subr.bf16.mxu1 %v3232_v6  ;;  %v3230_v12 = vld [vmem:[%s4714_s25 + $0x10] sm:$0xff]   ;;  %v3231_v13 = vld [vmem:[%s4714_s25 + $0x18] sm:$0xff]   ;;  %v3240_v53 = vld [vmem:[%s4717_s0] sm:$0xff]  }
  0xf3   :  { %2937 = vmatpush3.bf16.msra.mxu1 %v3232_v6  ;;  %v3234_v14 = vld [vmem:[%s4715_s3 + $0x10] sm:$0xff]   ;;  %v3235_v15 = vld [vmem:[%s4715_s3 + $0x18] sm:$0xff]   ;;  %s4716_s3 = sld [smem:[#allocation35_spill]]  ;;  %v3241_v54 = vld [vmem:[%s4717_s0 + $0x8] sm:$0xff]  }
  0xf4   :  { %2915 = vmatpush3.bf16.msra.mxu0 %v3221_v1  ;;  %2938 = vmatprep.subr.bf16.mxu1 %v3233_v7  ;;  %v3242_v55 = vld [vmem:[%s4717_s0 + $0x10] sm:$0xff]   ;;  %v3243_v56 = vld [vmem:[%s4717_s0 + $0x18] sm:$0xff]   ;;  %v3244_v57 = vld [vmem:[%s4717_s0 + $0x20] sm:$0xff]  }
  0xf5   :  { %2916 = vmatprep.subr.bf16.mxu0 %v3222_v2  ;;  %v3245_v58 = vld [vmem:[%s4717_s0 + $0x28] sm:$0xff]  }
  0xf7   :  { %2939 = vmatpush3.bf16.msra.mxu1 %v3233_v7 }
  0xf8   :  { %2917 = vmatpush3.bf16.msra.mxu0 %v3222_v2  ;;  %2940 = vmatprep.subr.bf16.mxu1 %v3234_v14 }
  0xf9   :  { %2918 = vmatprep.subr.bf16.mxu0 %v3223_v3  ;;  %v3236_v27 = vld [vmem:[%s4716_s3] sm:$0xff]   ;;  %v3237_v37 = vld [vmem:[%s4716_s3 + $0x8] sm:$0xff]   ;;  %v3238_v51 = vld [vmem:[%s4716_s3 + $0x10] sm:$0xff]  }
  0xfa   :  { %v3239_v52 = vld [vmem:[%s4716_s3 + $0x18] sm:$0xff]  }
  0xfb   :  { %2941 = vmatpush3.bf16.msra.mxu1 %v3234_v14 }
  0xfc   :  { %2919 = vmatpush3.bf16.msra.mxu0 %v3223_v3  ;;  %2942 = vmatprep.subr.bf16.mxu1 %v3235_v15 }
  0xfd   :  { %2920 = vmatprep.subr.bf16.mxu0 %v3224_v5 }
  0xff   :  { %2943 = vmatpush3.bf16.msra.mxu1 %v3235_v15 }
 0x100   :  { %2921 = vmatpush3.bf16.msra.mxu0 %v3224_v5  ;;  %2952 = vmatprep.subr.bf16.mxu1 %v3236_v27 }
 0x101   :  { %2922 = vmatprep.subr.bf16.mxu0 %v3225_v8 }
 0x104   :  { %2923 = vmatpush3.bf16.msra.mxu0 %v3225_v8 }
 0x105   :  { %2924 = vmatprep.subr.bf16.mxu0 %v3226_v9 }
 0x108   :  { %2925 = vmatpush3.bf16.msra.mxu0 %v3226_v9 }
 0x109   :  { %2926 = vmatprep.subr.bf16.mxu0 %v3227_v10 }
 0x10c   :  { %2927 = vmatpush3.bf16.msra.mxu0 %v3227_v10 }
 0x10d   :  { %2968 = vmatprep.subr.bf16.mxu0 %v3240_v53 }
 0x10f   :  { %2929 = vmatmul.mubr.bf16.vlgmr.msra.gmra.mrb[0].mxu0 %v3229_v11 }
 0x110   :  { %2932 = vmatprep.mubr.bf16.mxu0 %v3230_v12  ;;  %2969 = vmatpush3.bf16.msra.mxu0 %v3240_v53 }
 0x111   :  { %2970 = vmatprep.subr.bf16.mxu0 %v3241_v54 }
 0x114   :  { %2971 = vmatpush3.bf16.msra.mxu0 %v3241_v54 }
 0x115   :  { %2972 = vmatprep.subr.bf16.mxu0 %v3242_v55 }
 0x117   :  { %2933 = vmatmul.mubr.bf16.gmra.mrb[4].mxu0 %v3231_v13 }
 0x118   :  { %2973 = vmatpush3.bf16.msra.mxu0 %v3242_v55 }
 0x119   :  { %2974 = vmatprep.subr.bf16.mxu0 %v3243_v56 }
 0x11c   :  { %2975 = vmatpush3.bf16.msra.mxu0 %v3243_v56 }
 0x11d   :  { %2976 = vmatprep.subr.bf16.mxu0 %v3244_v57 }
 0x120   :  { %2977 = vmatpush3.bf16.msra.mxu0 %v3244_v57 }
 0x121   :  { %2978 = vmatprep.subr.bf16.mxu0 %v3245_v58 }
 0x124   :  { %2979 = vmatpush3.bf16.msra.mxu0 %v3245_v58 }
 0x1e2   :  { %v2930_v17 = vpop.f32.mrb[0].mxu0 }
 0x1e3   :  { %v3958_v18 = vadd.f32 %v2930_v17, %v2655_v16  ;;  %v347_v19 = vpop.f32.mrb[1].mxu0 }
 0x1e4   :  { %v3960_v20 = vadd.f32 %v2655_v16, %v347_v19  ;;  %v2931_v21 = vpop.f32.mrb[2].mxu0 }
 0x1e5   :  { %v3962_v22 = vadd.f32 %v2931_v21, %v2655_v16  ;;  %v350_v23 = vpop.f32.mrb[3].mxu0  ;;  %v1320_v24 = vpack.c.bf16 %v2931_v21, %v2930_v17  ;;  %v4700_v28 = vmax.f32 %v3958_v18, 0.0 }
 0x1e6   :  { %v3964_v25 = vadd.f32 %v2655_v16, %v350_v23  ;;  %v1319_v26 = vpack.c.bf16 %v350_v23, %v347_v19  ;;  %v4699_v30 = vmax.f32 %v3960_v20, 0.0 }
 0x1e7   :  { %v4698_v29 = vmax.f32 %v3962_v22, 0.0 }
 0x1e8   :  { %v4697_v31 = vmax.f32 %v3964_v25, 0.0  ;;  %1347 = vrot.lane.b32.xlu0 %v1319_v26, %s3635_s15 }
 0x1e9   :  { %v402_v32 = vpack.c.bf16 %v4698_v29, %v4700_v28 }
 0x1ea   :  { %v2934_v33 = vpop.f32.mrb[4].mxu0  ;;  %v401_v34 = vpack.c.bf16 %v4697_v31, %v4699_v30  ;;  %v3268_v31 = vld [vmem:[%s4659_s16 + $0x8] sm:$0xff]  }
 0x1eb   :  { %v3982_v35 = vadd.f32 %v2934_v33, %v2655_v16  ;;  %v363_v36 = vpop.f32.mrb[5].mxu0 }
 0x1ec   :  { %v3987_v38 = vadd.f32 %v2655_v16, %v363_v36  ;;  %1349 = vrot.lane.b32.xlu0 %v1320_v24, %s3635_s15  ;;  %v2935_v39 = vpop.f32.mrb[6].mxu0  ;;  %2944 = vmatprep.mubr.msk.bf16.mxu1 %vm444_vm0, %v401_v34  ;;  %v3248_v34 = vld [vmem:[#allocation10] ss:$8 sps:$4 sm:$0xff]  }
 0x1ed   :  { %v4696_v40 = vmax.f32 %v3982_v35, 0.0  ;;  %v3992_v41 = vadd.f32 %v2935_v39, %v2655_v16  ;;  %v366_v42 = vpop.f32.mrb[7].mxu0  ;;  %2945 = vmatmul.mubr.msk.bf16.vlgmr.msra.gmra.mrb[0].mxu1 %vm444_vm0, %v402_v32  ;;  %v1322_v43 = vpack.c.bf16 %v2935_v39, %v2934_v33  ;;  %v3246_v32 = vld [vmem:[%s4717_s0 + $0x30] sm:$0xff]   ;;  %v3247_v33 = vld [vmem:[%s4717_s0 + $0x38] sm:$0xff]  }
 0x1ee   :  { %v4695_v44 = vmax.f32 %v3987_v38, 0.0  ;;  %v3996_v45 = vadd.f32 %v2655_v16, %v366_v42  ;;  %v1321_v46 = vpack.c.bf16 %v366_v42, %v363_v36  ;;  %2953 = vmatpush3.bf16.msra.mxu1 %v3236_v27  ;;  %2980 = vmatprep.subr.bf16.mxu0 %v3246_v32  ;;  %v3250_v36 = vld [vmem:[#allocation10 + $0x4] ss:$8 sps:$4 sm:$0xff]  }
 0x1ef   :  { %v4694_v47 = vmax.f32 %v3992_v41, 0.0  ;;  %2954 = vmatprep.subr.bf16.mxu1 %v3237_v37  ;;  %2981 = vmatpush3.bf16.msra.mxu0 %v3246_v32 }
 0x1f0   :  { %v4693_v48 = vmax.f32 %v3996_v45, 0.0  ;;  %1351 = vrot.lane.b32.xlu1 %v1321_v46, %s3635_s15  ;;  %2982 = vmatprep.subr.bf16.mxu0 %v3247_v33 }
 0x1f1   :  { %v404_v49 = vpack.c.bf16 %v4694_v47, %v4696_v40 }
 0x1f2   :  { %v403_v50 = vpack.c.bf16 %v4693_v48, %v4695_v44  ;;  %2955 = vmatpush3.bf16.msra.mxu1 %v3237_v37  ;;  %v2665_v37 = vld [vmem:[#allocation7] ss:$0 sm:$0xff] }
 0x1f3   :  { %2956 = vmatprep.subr.bf16.mxu1 %v3238_v51  ;;  %2983 = vmatpush3.bf16.msra.mxu0 %v3247_v33  ;;  %v3251_v33 = vld [vmem:[%s4655_s12] sm:$0xff]  }
 0x1f4   :  { %2948 = vmatprep.mubr.msk.bf16.mxu1 %vm444_vm0, %v403_v50  ;;  %1353 = vrot.lane.b32.xlu1 %v1322_v43, %s3635_s15 }
 0x1f5   :  { %2949 = vmatmul.mubr.msk.bf16.gmra.mrb[4].mxu1 %vm444_vm0, %v404_v49 }
 0x1f6   :  { %2957 = vmatpush3.bf16.msra.mxu1 %v3238_v51 }
 0x1f7   :  { %2958 = vmatprep.subr.bf16.mxu1 %v3239_v52 }
 0x1fa   :  { %2959 = vmatpush3.bf16.msra.mxu1 %v3239_v52 }
 0x1fb   :  { %827 = vmatprep.subr.bf16.mxu1 %v3250_v36 }
 0x2c0   :  { %v2946_v60 = vpop.f32.mrb[0].mxu1 }
 0x2c1   :  { %v4036_v61 = vadd.f32 %v2946_v60, %v2656_v59  ;;  %v491_v62 = vpop.f32.mrb[1].mxu1 }
 0x2c2   :  { %v4038_v63 = vadd.f32 %v2656_v59, %v491_v62  ;;  %v2947_v0 = vpop.f32.mrb[2].mxu1 }
 0x2c3   :  { %v4040_v1 = vadd.f32 %v2947_v0, %v2656_v59  ;;  %v494_v2 = vpop.f32.mrb[3].mxu1  ;;  %v4692_v4 = vmax.f32 %v4036_v61, 0.0 }
 0x2c4   :  { %v4042_v3 = vadd.f32 %v2656_v59, %v494_v2  ;;  %v4691_v6 = vmax.f32 %v4038_v63, 0.0 }
 0x2c5   :  { %v4690_v5 = vmax.f32 %v4040_v1, 0.0 }
 0x2c6   :  { %v4689_v7 = vmax.f32 %v4042_v3, 0.0 }
 0x2c7   :  { %v531_v8 = vpack.c.bf16 %v4690_v5, %v4692_v4 }
 0x2c8   :  { %v530_v9 = vpack.c.bf16 %v4689_v7, %v4691_v6  ;;  %v2950_v10 = vpop.f32.mrb[4].mxu1 }
 0x2c9   :  { %v4056_v11 = vadd.f32 %v2950_v10, %v2656_v59  ;;  %v507_v12 = vpop.f32.mrb[5].mxu1 }
 0x2ca   :  { %v4058_v13 = vadd.f32 %v2656_v59, %v507_v12  ;;  %v2951_v14 = vpop.f32.mrb[6].mxu1  ;;  %2960 = vmatprep.mubr.msk.bf16.mxu1 %vm444_vm0, %v530_v9 }
 0x2cb   :  { %v4688_v15 = vmax.f32 %v4056_v11, 0.0  ;;  %v4062_v16 = vadd.f32 %v2951_v14, %v2656_v59  ;;  %v510_v17 = vpop.f32.mrb[7].mxu1  ;;  %2961 = vmatmul.mubr.msk.bf16.vlgmr.msra.gmra.mrb[8].mxu1 %vm444_vm0, %v531_v8 }
 0x2cc   :  { %v4687_v19 = vmax.f32 %v4058_v13, 0.0  ;;  %v4066_v21 = vadd.f32 %v2656_v59, %v510_v17  ;;  %828 = vmatpush1.bf16.msra.mxu1 %v3248_v34  ;;  %v3645_v34 = vmov 0  }
 0x2cd   :  { %v4686_v23 = vmax.f32 %v4062_v16, 0.0  ;;  %2992 = vmatprep.subr.bf16.mxu1 %v3251_v33 }
 0x2ce   :  { %v4685_v24 = vmax.f32 %v4066_v21, 0.0 }
 0x2cf   :  { %v533_v26 = vpack.c.bf16 %v4686_v23, %v4688_v15 }
 0x2d0   :  { %v532_v27 = vpack.c.bf16 %v4685_v24, %v4687_v19 }
 0x2d2   :  { %2964 = vmatprep.mubr.msk.bf16.mxu1 %vm444_vm0, %v532_v27 }
 0x2d3   :  { %2965 = vmatmul.mubr.msk.bf16.gmra.mrb[12].mxu1 %vm444_vm0, %v533_v26 }
 0x2d4   :  { %859 = vmatprep.mubr.bf16.mxu1 %v3645_v34 }
 0x39e   :  { %v2962_v39 = vpop.f32.mrb[8].mxu1 }
 0x39f   :  { %v4086_v42 = vadd.f32 %v2962_v39, %v2665_v37  ;;  %v619_v43 = vpop.f32.mrb[9].mxu1 }
 0x3a0   :  { %v4088_v46 = vadd.f32 %v2665_v37, %v619_v43  ;;  %v2963_v49 = vpop.f32.mrb[10].mxu1 }
 0x3a1   :  { %v4090_v50 = vadd.f32 %v2963_v49, %v2665_v37  ;;  %v622_v51 = vpop.f32.mrb[11].mxu1  ;;  %v4684_v53 = vmax.f32 %v4086_v42, 0.0 }
 0x3a2   :  { %v4092_v52 = vadd.f32 %v2665_v37, %v622_v51  ;;  %v4683_v55 = vmax.f32 %v4088_v46, 0.0 }
 0x3a3   :  { %v4682_v54 = vmax.f32 %v4090_v50, 0.0 }
 0x3a4   :  { %v4681_v56 = vmax.f32 %v4092_v52, 0.0 }
 0x3a5   :  { %v659_v57 = vpack.c.bf16 %v4682_v54, %v4684_v53 }
 0x3a6   :  { %v658_v58 = vpack.c.bf16 %v4681_v56, %v4683_v55  ;;  %v2966_v59 = vpop.f32.mrb[12].mxu1 }
 0x3a7   :  { %v4106_v60 = vadd.f32 %v2966_v59, %v2665_v37  ;;  %v635_v62 = vpop.f32.mrb[13].mxu1  ;;  %v3252_v59 = vld [vmem:[%s4655_s12 + $0x8] sm:$0xff]  }
 0x3a8   :  { %v4108_v0 = vadd.f32 %v2665_v37, %v635_v62  ;;  %v2967_v2 = vpop.f32.mrb[14].mxu1  ;;  %2984 = vmatprep.mubr.bf16.mxu0 %v658_v58 }
 0x3a9   :  { %v4110_v8 = vadd.f32 %v2967_v2, %v2665_v37  ;;  %v638_v9 = vpop.f32.mrb[15].mxu1  ;;  %2985 = vmatmul.mubr.bf16.vlgmr.msra.gmra.mrb[8].mxu0 %v659_v57  ;;  %v4680_v12 = vmax.f32 %v4106_v60, 0.0 }
 0x3aa   :  { %v4112_v10 = vadd.f32 %v2665_v37, %v638_v9  ;;  %v4679_v17 = vmax.f32 %v4108_v0, 0.0  ;;  %v2674_v37 = vld [vmem:[#allocation8] ss:$0 sm:$0xff] }
 0x3ab   :  { %v4678_v14 = vmax.f32 %v4110_v8, 0.0 }
 0x3ac   :  { %v4677_v26 = vmax.f32 %v4112_v10, 0.0 }
 0x3ad   :  { %v661_v27 = vpack.c.bf16 %v4678_v14, %v4680_v12 }
 0x3ae   :  { %v660_v32 = vpack.c.bf16 %v4677_v26, %v4679_v17 }
 0x3b0   :  { %2988 = vmatprep.mubr.bf16.mxu0 %v660_v32  ;;  %v3253_v32 = vld [vmem:[%s4655_s12 + $0x10] sm:$0xff]  }
 0x3b1   :  { %2989 = vmatmul.mubr.bf16.gmra.mrb[12].mxu0 %v661_v27 }
 0x47c   :  { %v2986_v36 = vpop.f32.mrb[8].mxu0 }
 0x47d   :  { %v767_v39 = vpop.f32.mrb[9].mxu0 }
 0x47e   :  { %v2987_v43 = vpop.f32.mrb[10].mxu0  ;;  %v4129_v51 = vadd.f32 %v2674_v37, %v767_v39 }
 0x47f   :  { %v770_v49 = vpop.f32.mrb[11].mxu0  ;;  %v4139_v9 = vadd.f32 %v2987_v43, %v2674_v37 }
 0x480   :  { %v4131_v57 = vadd.f32 %v2674_v37, %v770_v49  ;;  %v4144_v49 = vadd.f32 %v2986_v36, %v2674_v37  ;;  %v3255_v36 = vld [vmem:[%s4655_s12 + $0x20] sm:$0xff]  }
 0x482   :  { %v798_v58 = vpack.c.bf16 %v4131_v57, %v4129_v51  ;;  %v799_v26 = vpack.c.bf16 %v4139_v9, %v4144_v49 }
 0x484   :  { %v2990_v62 = vpop.f32.mrb[12].mxu0  ;;  %2685 = vmatmul.mubr.msk.bf16.vlgmr.msra.gmra.mrb[16].mxu1 %vm814_vm1, %v798_v58 }
 0x485   :  { %2993 = vmatpush3.bf16.msra.mxu1 %v3251_v33  ;;  %v783_v2 = vpop.f32.mrb[13].mxu0  ;;  %869 = vmatprep.mubr.bf16.mxu1 %v3645_v34  ;;  %v3254_v33 = vld [vmem:[%s4655_s12 + $0x18] sm:$0xff]  }
 0x486   :  { %v2991_v27 = vpop.f32.mrb[14].mxu0  ;;  %2994 = vmatprep.subr.bf16.mxu1 %v3252_v59  ;;  %v4157_v58 = vadd.f32 %v2674_v37, %v783_v2  ;;  %v3257_v2 = vld [vmem:[%s4655_s12 + $0x30] sm:$0xff]  }
 0x487   :  { %v786_v39 = vpop.f32.mrb[15].mxu0 }
 0x488   :  { %v4152_v43 = vadd.f32 %v2674_v37, %v786_v39  ;;  %v4170_v39 = vadd.f32 %v2990_v62, %v2674_v37  ;;  %v3264_v62 = vld [vmem:[%s4657_s14 + $0x8] sm:$0xff]  }
 0x489   :  { %2995 = vmatpush3.bf16.msra.mxu1 %v3252_v59 }
 0x48a   :  { %2996 = vmatprep.subr.bf16.mxu1 %v3253_v32  ;;  %v800_v59 = vpack.c.bf16 %v4152_v43, %v4157_v58 }
 0x48c   :  { %2686 = vmatmul.mubr.msk.bf16.gmra.mrb[20].mxu1 %vm814_vm1, %v799_v26  ;;  %v3256_v26 = vld [vmem:[%s4655_s12 + $0x28] sm:$0xff]  }
 0x48d   :  { %2997 = vmatpush3.bf16.msra.mxu1 %v3253_v32  ;;  %879 = vmatprep.mubr.bf16.mxu1 %v3645_v34  ;;  %v4165_v32 = vadd.f32 %v2991_v27, %v2674_v37  ;;  %v3263_v37 = vld [vmem:[%s4657_s14] sm:$0xff]   ;;  %v2689_v27 = vld [vmem:[#allocation11] ss:$0 sm:$0xff] }
 0x48e   :  { %2998 = vmatprep.subr.bf16.mxu1 %v3254_v33  ;;  %3016 = vmatprep.subr.bf16.mxu0 %v3263_v37 }
 0x48f   :  { %3017 = vmatpush3.bf16.msra.mxu0 %v3263_v37 }
 0x490   :  { %3018 = vmatprep.subr.bf16.mxu0 %v3264_v62 }
 0x491   :  { %2999 = vmatpush3.bf16.msra.mxu1 %v3254_v33  ;;  %v801_v33 = vpack.c.bf16 %v4165_v32, %v4170_v39 }
 0x492   :  { %3000 = vmatprep.subr.bf16.mxu1 %v3255_v36 }
 0x493   :  { %3019 = vmatpush3.bf16.msra.mxu0 %v3264_v62 }
 0x494   :  { %2687 = vmatmul.mubr.msk.bf16.gmra.mrb[24].mxu1 %vm814_vm1, %v800_v59  ;;  %v3258_v59 = vld [vmem:[%s4655_s12 + $0x38] sm:$0xff]  }
 0x495   :  { %3001 = vmatpush3.bf16.msra.mxu1 %v3255_v36  ;;  %889 = vmatprep.mubr.bf16.mxu1 %v3645_v34  ;;  %v1348_v34 = vpop.permute.xlu0 %1347 }
 0x496   :  { %3002 = vmatprep.subr.bf16.mxu1 %v3256_v26 }
 0x499   :  { %3003 = vmatpush3.bf16.msra.mxu1 %v3256_v26 }
 0x49a   :  { %3004 = vmatprep.subr.bf16.mxu1 %v3257_v2 }
 0x49c   :  { %2688 = vmatmul.mubr.msk.bf16.gmra.mrb[28].mxu1 %vm814_vm1, %v801_v33 }
 0x49d   :  { %3005 = vmatpush3.bf16.msra.mxu1 %v3257_v2 }
 0x49e   :  { %3006 = vmatprep.subr.bf16.mxu1 %v3258_v59 }
 0x4a1   :  { %3007 = vmatpush3.bf16.msra.mxu1 %v3258_v59 }
 0x4a2   :  { %3048 = vmatprep.subr.bf16.mxu1 %v1348_v34 }
 0x557   :  { %v861_v36 = vpop.f32.mrb[16].mxu1 }
 0x558   :  { %v907_v26 = vadd.f32 %v2689_v27, %v861_v36  ;;  %v4184_v2 = vpop.f32.mrb[17].mxu1 }
 0x559   :  { %v865_v33 = vpop.f32.mrb[18].mxu1 }
 0x55a   :  { %v908_v59 = vadd.f32 %v2689_v27, %v865_v33  ;;  %v4186_v14 = vpop.f32.mrb[19].mxu1  ;;  %v915_v17 = vmax.f32 %v907_v26, 0.0  ;;  %v1350_v26 = vpop.permute.xlu0 %1349 }
 0x55c   :  { %v916_v12 = vmax.f32 %v908_v59, 0.0 }
 0x55e   :  { %v923_v56 = vpack.c.bf16 %v916_v12, %v915_v17 }
 0x55f   :  { %v871_v54 = vpop.f32.mrb[20].mxu1 }
 0x560   :  { %v909_v55 = vadd.f32 %v2689_v27, %v871_v54  ;;  %v4188_v53 = vpop.f32.mrb[21].mxu1  ;;  %3008 = vmatprep.mubr.bf16.mxu1 %v923_v56  ;;  %v1352_v56 = vpop.permute.xlu1 %1351 }
 0x561   :  { %v875_v37 = vpop.f32.mrb[22].mxu1 }
 0x562   :  { %v910_v24 = vadd.f32 %v2689_v27, %v875_v37  ;;  %v4190_v62 = vpop.f32.mrb[23].mxu1  ;;  %v917_v23 = vmax.f32 %v909_v55, 0.0 }
 0x564   :  { %v918_v36 = vmax.f32 %v910_v24, 0.0 }
 0x566   :  { %v924_v19 = vpack.c.bf16 %v918_v36, %v917_v23 }
 0x567   :  { %v881_v15 = vpop.f32.mrb[24].mxu1 }
 0x568   :  { %v911_v7 = vadd.f32 %v2689_v27, %v881_v15  ;;  %v4192_v33 = vpop.f32.mrb[25].mxu1  ;;  %3009 = vmatmul.mubr.bf16.vlgmr.msra.gmra.mrb[32].mxu1 %v924_v19  ;;  %v1354_v15 = vpop.permute.xlu1 %1353 }
 0x569   :  { %3049 = vmatpush3.bf16.msra.mxu1 %v1348_v34  ;;  %v885_v12 = vpop.f32.mrb[26].mxu1 }
 0x56a   :  { %v912_v17 = vadd.f32 %v2689_v27, %v885_v12  ;;  %3050 = vmatprep.subr.bf16.mxu1 %v1350_v26  ;;  %v4194_v54 = vpop.f32.mrb[27].mxu1  ;;  %v919_v59 = vmax.f32 %v911_v7, 0.0  ;;  %v4203_v7 = vld [vmem:[%s4719_s9] sm:$0xff]  }
 0x56c   :  { %v920_v37 = vmax.f32 %v912_v17, 0.0  ;;  %v3265_v17 = vld [vmem:[%s4657_s14 + $0x10] sm:$0xff]  }
 0x56d   :  { %3051 = vmatpush3.bf16.msra.mxu1 %v1350_v26  ;;  %3020 = vmatprep.subr.bf16.mxu0 %v3265_v17 }
 0x56e   :  { %v925_v5 = vpack.c.bf16 %v920_v37, %v919_v59  ;;  %3052 = vmatprep.subr.bf16.mxu1 %v1352_v56  ;;  %3021 = vmatpush3.bf16.msra.mxu0 %v3265_v17  ;;  %v3267_v59 = vld [vmem:[%s4659_s16] sm:$0xff]   ;;  %v2690_v37 = vld [vmem:[#allocation13] ss:$0 sm:$0xff] }
 0x56f   :  { %v891_v24 = vpop.f32.mrb[28].mxu1 }
 0x570   :  { %v913_v23 = vadd.f32 %v2689_v27, %v891_v24  ;;  %v4196_v55 = vpop.f32.mrb[29].mxu1  ;;  %3012 = vmatprep.mubr.bf16.mxu1 %v925_v5  ;;  %v4210_v5 = vld [vmem:[%s4719_s9 + $0x8] sm:$0xff]  }
 0x571   :  { %3053 = vmatpush3.bf16.msra.mxu1 %v1352_v56  ;;  %v895_v19 = vpop.f32.mrb[30].mxu1  ;;  %v3266_v56 = vld [vmem:[%s4657_s14 + $0x18] sm:$0xff]  }
 0x572   :  { %v914_v34 = vadd.f32 %v2689_v27, %v895_v19  ;;  %3054 = vmatprep.subr.bf16.mxu1 %v1354_v15  ;;  %v4198_v36 = vpop.f32.mrb[31].mxu1  ;;  %v921_v12 = vmax.f32 %v913_v23, 0.0  ;;  %v4215_v27 = vld [vmem:[%s4719_s9 + $0x10] sm:$0xff]   ;;  %3022 = vmatprep.subr.bf16.mxu0 %v3266_v56 }
 0x573   :  { %4718 = vst [vmem:[#allocation28_spill] sm:$0xff] %v4198_v36  ;;  %3023 = vmatpush3.bf16.msra.mxu0 %v3266_v56 }
 0x574   :  { %v922_v6 = vmax.f32 %v914_v34, 0.0  ;;  %3032 = vmatprep.subr.bf16.mxu0 %v3267_v59 }
 0x575   :  { %3055 = vmatpush3.bf16.msra.mxu1 %v1354_v15 }
 0x576   :  { %v926_v26 = vpack.c.bf16 %v922_v6, %v921_v12  ;;  %v4224_v6 = vld [vmem:[%s4719_s9 + $0x18] sm:$0xff]  }
 0x578   :  { %3013 = vmatmul.mubr.bf16.gmra.mrb[36].mxu1 %v926_v26 }
 0x579   :  { %3056 = vmatprep.mubr.msk.bf16.mxu1 %vm444_vm0, %v4203_v7 }
 0x580   :  { %3057 = vmatmul.mubr.msk.bf16.vlgmr.msra.gmra.mrb[40].mxu1 %vm444_vm0, %v4210_v5 }
 0x581   :  { %3060 = vmatprep.mubr.msk.bf16.mxu1 %vm444_vm0, %v4215_v27 }
 0x588   :  { %3061 = vmatmul.mubr.msk.bf16.gmra.mrb[44].mxu1 %vm444_vm0, %v4224_v6 }
 0x589   :  { %3088 = vmatprep.mubr.msk.bf16.mxu1 %vm444_vm0, %v4203_v7 }
 0x63b   :  { %v3010_v24 = vpop.f32.mrb[32].mxu1 }
 0x63c   :  { %v1041_v23 = vadd.f32 %v3010_v24, %v2690_v37  ;;  %v1032_v15 = vpop.f32.mrb[33].mxu1 }
 0x63d   :  { %v1033_v19 = vadd.f32 %v2690_v37, %v1032_v15  ;;  %v3011_v34 = vpop.f32.mrb[34].mxu1 }
 0x63e   :  { %v1044_v12 = vadd.f32 %v3011_v34, %v2690_v37  ;;  %v1035_v26 = vpop.f32.mrb[35].mxu1  ;;  %v1065_v4 = vmax.f32 %v1041_v23, 0.0 }
 0x63f   :  { %v1036_v17 = vadd.f32 %v2690_v37, %v1035_v26  ;;  %v1063_v47 = vmax.f32 %v1033_v19, 0.0 }
 0x640   :  { %v1066_v48 = vmax.f32 %v1044_v12, 0.0 }
 0x641   :  { %v1064_v44 = vmax.f32 %v1036_v17, 0.0 }
 0x642   :  { %v1072_v40 = vpack.c.bf16 %v1066_v48, %v1065_v4 }
 0x643   :  { %v1071_v56 = vpack.c.bf16 %v1064_v44, %v1063_v47 }
 0x645   :  { %3024 = vmatprep.mubr.msk.bf16.mxu0 %vm444_vm0, %v1071_v56 }
 0x646   :  { %3025 = vmatmul.mubr.msk.bf16.vlgmr.msra.gmra.mrb[16].mxu0 %vm444_vm0, %v1072_v40 }
 0x647   :  { %3033 = vmatpush3.bf16.msra.mxu0 %v3267_v59 }
 0x648   :  { %3034 = vmatprep.subr.bf16.mxu0 %v3268_v31 }
 0x64b   :  { %v3014_v24 = vpop.f32.mrb[36].mxu1  ;;  %3035 = vmatpush3.bf16.msra.mxu0 %v3268_v31 }
 0x64c   :  { %v1057_v15 = vadd.f32 %v3014_v24, %v2690_v37  ;;  %v1048_v34 = vpop.f32.mrb[37].mxu1  ;;  %v4720_v24 = vmax.f32 %v3958_v18, 0.0 }
 0x64d   :  { %v1049_v23 = vadd.f32 %v2690_v37, %v1048_v34  ;;  %v3015_v12 = vpop.f32.mrb[38].mxu1 }
 0x64e   :  { %v1060_v19 = vadd.f32 %v3015_v12, %v2690_v37  ;;  %v1051_v26 = vpop.f32.mrb[39].mxu1  ;;  %v1069_v44 = vmax.f32 %v1057_v15, 0.0  ;;  %v1454_v34 = vmul.f32 0.5, %v4720_v24  ;;  %v4721_v15 = vmax.f32 %v3960_v20, 0.0 }
 0x64f   :  { %v1052_v48 = vadd.f32 %v2690_v37, %v1051_v26  ;;  %v1067_v4 = vmax.f32 %v1049_v23, 0.0 }
 0x650   :  { %v1070_v47 = vmax.f32 %v1060_v19, 0.0  ;;  %v1452_v23 = vmul.f32 0.5, %v4721_v15 }
 0x651   :  { %v1068_v17 = vmax.f32 %v1052_v48, 0.0  ;;  %v4722_v48 = vmax.f32 %v3962_v22, 0.0 }
 0x652   :  { %v1074_v29 = vpack.c.bf16 %v1070_v47, %v1069_v44 }
 0x653   :  { %v1073_v30 = vpack.c.bf16 %v1068_v17, %v1067_v4  ;;  %v3058_v56 = vpop.f32.mrb[40].mxu1  ;;  %v1455_v44 = vmul.f32 0.5, %v4722_v48  ;;  %v4723_v4 = vmax.f32 %v3964_v25, 0.0  ;;  %v4724_v25 = vmax.f32 %v3982_v35, 0.0 }
 0x654   :  { %v1438_v28 = vmax.f32 %v3058_v56, 0.0  ;;  %v1405_v40 = vpop.f32.mrb[41].mxu1 }
 0x655   :  { %v1436_v59 = vmax.f32 %v1405_v40, 0.0  ;;  %3028 = vmatprep.mubr.msk.bf16.mxu0 %vm444_vm0, %v1073_v30  ;;  %v3059_v31 = vpop.f32.mrb[42].mxu1  ;;  %v1453_v18 = vmul.f32 0.5, %v4723_v4 }
 0x656   :  { %v1446_v36 = vmul.f32 0.5, %v1438_v28  ;;  %v1439_v12 = vmax.f32 %v3059_v31, 0.0  ;;  %3029 = vmatmul.mubr.msk.bf16.gmra.mrb[20].mxu0 %vm444_vm0, %v1074_v29  ;;  %v1408_v37 = vpop.f32.mrb[43].mxu1 }
 0x657   :  { %v1444_v19 = vmul.f32 0.5, %v1436_v59  ;;  %v1437_v26 = vmax.f32 %v1408_v37, 0.0 }
 0x658   :  { %v4252_v47 = vadd.f32 %v1454_v34, %v1446_v36  ;;  %v1447_v30 = vmul.f32 0.5, %v1439_v12  ;;  %v1458_v34 = vmul.f32 0.5, %v4724_v25 }
 0x659   :  { %v4256_v17 = vadd.f32 %v1452_v23, %v1444_v19  ;;  %v1445_v28 = vmul.f32 0.5, %v1437_v26  ;;  %v4725_v23 = vmax.f32 %v3987_v38, 0.0  ;;  %v3269_v38 = vld [vmem:[%s4659_s16 + $0x10] sm:$0xff]  }
 0x65a   :  { %v4258_v56 = vadd.f32 %v1455_v44, %v1447_v30  ;;  %v4726_v44 = vmax.f32 %v3992_v41, 0.0  ;;  %3036 = vmatprep.subr.bf16.mxu0 %v3269_v38  ;;  %v3270_v41 = vld [vmem:[%s4659_s16 + $0x18] sm:$0xff]   ;;  %s3647_s16 = smov [#allocation20]  }
 0x65b   :  { %v4260_v29 = vadd.f32 %v1453_v18, %v1445_v28  ;;  %v3062_v20 = vpop.f32.mrb[44].mxu1  ;;  %v1456_v19 = vmul.f32 0.5, %v4725_v23  ;;  %v4727_v28 = vmax.f32 %v3996_v45, 0.0  ;;  %3037 = vmatpush3.bf16.msra.mxu0 %v3269_v38  ;;  %v3271_v45 = vld [vmem:[#allocation17] sm:$0xff]   ;;  %s2622_s3 = sshll.u32 %s3647_s16, 4  ;;  %s2623_s3 = int_to_ptr.vmem [resolvable:$true] %s2622_s3 }
 0x65c   :  { %v1442_v59 = vmax.f32 %v3062_v20, 0.0  ;;  %v1421_v22 = vpop.f32.mrb[45].mxu1  ;;  %v1459_v30 = vmul.f32 0.5, %v4726_v44  ;;  %3038 = vmatprep.subr.bf16.mxu0 %v3270_v41  ;;  %s3594_s8 = scalar_lea.vmem %s2623_s3, 1024  ;;  %p3599_p5 = scmp.lt.s32.totalorder %s2623_s3, %s2623_s3 }
 0x65d   :  { %v1468_v36 = vpack.c.bf16 %v4260_v29, %v4256_v17  ;;  %v1440_v31 = vmax.f32 %v1421_v22, 0.0  ;;  %v3063_v24 = vpop.f32.mrb[46].mxu1  ;;  %v1457_v20 = vmul.f32 0.5, %v4727_v28  ;;  %p3595_p4 = scmp.ne.s32.totalorder %s2623_s3, %s3594_s8  ;;  %p3600_p6 = scmp.lt.s32.totalorder %s3594_s8, %s3594_s8 }
 0x65e   :  { %v1450_v12 = vmul.f32 0.5, %v1442_v59  ;;  %v1443_v37 = vmax.f32 %v3063_v24, 0.0  ;;  %v1424_v15 = vpop.f32.mrb[47].mxu1 }
 0x65f   :  { %v1448_v26 = vmul.f32 0.5, %v1440_v31  ;;  %v1441_v48 = vmax.f32 %v1424_v15, 0.0  ;;  %3039 = vmatpush3.bf16.msra.mxu0 %v3270_v41  ;;  %v2699_v31 = vld [vmem:[#allocation14] ss:$0 sm:$0xff]  ;;  %p3601_p7 = por %p3600_p6, %p3599_p5 }
 0x660   :  { %v4272_v4 = vadd.f32 %v1458_v34, %v1450_v12  ;;  %v1451_v18 = vmul.f32 0.5, %v1443_v37  ;;  %3064 = vmatprep.subr.bf16.mxu0 %v3271_v45  ;;  %v3274_v41 = vld [vmem:[#allocation17 + $0x18] sm:$0xff]  }
 0x661   :  { %v1464_v22 = vadd.f32 %v1456_v19, %v1448_v26  ;;  %v1449_v35 = vmul.f32 0.5, %v1441_v48  ;;  %p3602_p8 = pnand %p3601_p7, %p3595_p4 }
 0x662   :  { %v1467_v25 = vadd.f32 %v1459_v30, %v1451_v18 }
 0x663   :  { %v1465_v59 = vadd.f32 %v1457_v20, %v1449_v35  ;;  %v3273_v35 = vld [vmem:[#allocation17 + $0x10] sm:$0xff]  }
 0x664   :  { %v1471_v24 = vpack.c.bf16 %v1467_v25, %v4272_v4 }
 0x665   :  { %v1470_v40 = vpack.c.bf16 %v1465_v59, %v1464_v22  ;;  %v3272_v22 = vld [vmem:[#allocation17 + $0x8] sm:$0xff]  }
 0x719   :  { %v3026_v34 = vpop.f32.mrb[16].mxu0 }
 0x71a   :  { %v1169_v12 = vadd.f32 %v3026_v34, %v2699_v31  ;;  %v1160_v37 = vpop.f32.mrb[17].mxu0 }
 0x71b   :  { %v1161_v15 = vadd.f32 %v2699_v31, %v1160_v37  ;;  %v3027_v23 = vpop.f32.mrb[18].mxu0 }
 0x71c   :  { %v1172_v19 = vadd.f32 %v3027_v23, %v2699_v31  ;;  %v1163_v26 = vpop.f32.mrb[19].mxu0  ;;  %v1193_v44 = vmax.f32 %v1169_v12, 0.0 }
 0x71d   :  { %v1164_v48 = vadd.f32 %v2699_v31, %v1163_v26  ;;  %v1191_v4 = vmax.f32 %v1161_v15, 0.0 }
 0x71e   :  { %v1194_v30 = vmax.f32 %v1172_v19, 0.0 }
 0x71f   :  { %v1192_v18 = vmax.f32 %v1164_v48, 0.0 }
 0x720   :  { %v1200_v28 = vpack.c.bf16 %v1194_v30, %v1193_v44 }
 0x721   :  { %v1199_v20 = vpack.c.bf16 %v1192_v18, %v1191_v4  ;;  %v3275_v4 = vld [vmem:[%s4662_s19] sm:$0xff]   ;;  %v2708_v18 = vld [vmem:[#allocation16] ss:$0 sm:$0xff] }
 0x723   :  { %3040 = vmatprep.mubr.msk.bf16.mxu0 %vm444_vm0, %v1199_v20 }
 0x724   :  { %3041 = vmatmul.mubr.msk.bf16.vlgmr.msra.gmra.mrb[24].mxu0 %vm444_vm0, %v1200_v28 }
 0x725   :  { %3065 = vmatpush3.bf16.msra.mxu0 %v3271_v45 }
 0x726   :  { %3066 = vmatprep.subr.bf16.mxu0 %v3272_v22 }
 0x729   :  { %v3030_v25 = vpop.f32.mrb[20].mxu0  ;;  %3067 = vmatpush3.bf16.msra.mxu0 %v3272_v22 }
 0x72a   :  { %v1185_v59 = vadd.f32 %v3030_v25, %v2699_v31  ;;  %v1176_v38 = vpop.f32.mrb[21].mxu0  ;;  %3068 = vmatprep.subr.bf16.mxu0 %v3273_v35 }
 0x72b   :  { %v1177_v34 = vadd.f32 %v2699_v31, %v1176_v38  ;;  %v3031_v12 = vpop.f32.mrb[22].mxu0 }
 0x72c   :  { %v1188_v37 = vadd.f32 %v3031_v12, %v2699_v31  ;;  %v1179_v15 = vpop.f32.mrb[23].mxu0  ;;  %v1197_v19 = vmax.f32 %v1185_v59, 0.0 }
 0x72d   :  { %v1180_v23 = vadd.f32 %v2699_v31, %v1179_v15  ;;  %3069 = vmatpush3.bf16.msra.mxu0 %v3273_v35  ;;  %v1195_v48 = vmax.f32 %v1177_v34, 0.0  ;;  %v4728_v31 = vpack.c.bf16 %v4258_v56, %v4252_v47 }
 0x72e   :  { %v1198_v26 = vmax.f32 %v1188_v37, 0.0  ;;  %3070 = vmatprep.subr.bf16.mxu0 %v3274_v41 }
 0x72f   :  { %v1196_v44 = vmax.f32 %v1180_v23, 0.0 }
 0x730   :  { %v1202_v45 = vpack.c.bf16 %v1198_v26, %v1197_v19 }
 0x731   :  { %v1201_v30 = vpack.c.bf16 %v1196_v44, %v1195_v48  ;;  %3071 = vmatpush3.bf16.msra.mxu0 %v3274_v41 }
 0x732   :  { %3096 = vmatprep.subr.bf16.mxu0 %v3275_v4 }
 0x733   :  { %3044 = vmatprep.mubr.msk.bf16.mxu0 %vm444_vm0, %v1201_v30 }
 0x734   :  { %3045 = vmatmul.mubr.msk.bf16.gmra.mrb[28].mxu0 %vm444_vm0, %v1202_v45 }
 0x735   :  { %3072 = vmatprep.mubr.msk.bf16.mxu0 %vm444_vm0, %v1468_v36 }
 0x73c   :  { %3073 = vmatmul.mubr.msk.bf16.vlgmr.msra.gmra.mrb[32].mxu0 %vm444_vm0, %v4728_v31 }
 0x73d   :  { %3076 = vmatprep.mubr.msk.bf16.mxu0 %vm444_vm0, %v1470_v40  ;;  %3097 = vmatpush3.bf16.msra.mxu0 %v3275_v4 }
 0x744   :  { %3077 = vmatmul.mubr.msk.bf16.gmra.mrb[36].mxu0 %vm444_vm0, %v1471_v24 }
 0x7f7   :  { %v3042_v28 = vpop.f32.mrb[24].mxu0 }
 0x7f8   :  { %v1297_v17 = vadd.f32 %v3042_v28, %v2708_v18  ;;  %v1288_v29 = vpop.f32.mrb[25].mxu0  ;;  %v3277_v28 = vld [vmem:[%s4662_s19 + $0x10] sm:$0xff]  }
 0x7f9   :  { %v1289_v36 = vadd.f32 %v2708_v18, %v1288_v29  ;;  %v3043_v20 = vpop.f32.mrb[26].mxu0 }
 0x7fa   :  { %2514 = vst [vmem:[#allocation20 + $0x10] sm:$0xff] %v1297_v17  ;;  %v1300_v47 = vadd.f32 %v3043_v20, %v2708_v18  ;;  %v1291_v56 = vpop.f32.mrb[27].mxu0  ;;  %v3278_v17 = vld [vmem:[%s4662_s19 + $0x18] sm:$0xff]  }
 0x7fb   :  { %2512 = vst [vmem:[#allocation20] sm:$0xff] %v1289_v36  ;;  %v1292_v22 = vadd.f32 %v2708_v18, %v1291_v56 }
 0x7fc   :  { %2515 = vst [vmem:[#allocation20 + $0x18] sm:$0xff] %v1300_v47 }
 0x7fd   :  { %2513 = vst [vmem:[#allocation20 + $0x8] sm:$0xff] %v1292_v22  ;;  %v4729_v22 = vmax.f32 %v4036_v61, 0.0 }
 0x807   :  { %v3046_v40 = vpop.f32.mrb[28].mxu0 }
 0x808   :  { %v1313_v24 = vadd.f32 %v3046_v40, %v2708_v18  ;;  %v1304_v35 = vpop.f32.mrb[29].mxu0  ;;  %v1668_v40 = vmul.f32 0.5, %v4729_v22 }
 0x809   :  { %v1305_v25 = vadd.f32 %v2708_v18, %v1304_v35  ;;  %v3047_v59 = vpop.f32.mrb[30].mxu0 }
 0x80a   :  { %2518 = vst [vmem:[#allocation20 + $0x30] sm:$0xff] %v1313_v24  ;;  %v1316_v38 = vadd.f32 %v3047_v59, %v2708_v18  ;;  %v1307_v41 = vpop.f32.mrb[31].mxu0  ;;  %v4730_v59 = vmax.f32 %v4038_v63, 0.0 }
 0x80b   :  { %2516 = vst [vmem:[#allocation20 + $0x20] sm:$0xff] %v1305_v25  ;;  %v1308_v34 = vadd.f32 %v2708_v18, %v1307_v41  ;;  %v3276_v18 = vld [vmem:[%s4662_s19 + $0x8] sm:$0xff]  }
 0x80c   :  { %2519 = vst [vmem:[#allocation20 + $0x38] sm:$0xff] %v1316_v38  ;;  %3098 = vmatprep.subr.bf16.mxu0 %v3276_v18  ;;  %v1666_v38 = vmul.f32 0.5, %v4730_v59 }
 0x80d   :  { %2517 = vst [vmem:[#allocation20 + $0x28] sm:$0xff] %v1308_v34  ;;  %3099 = vmatpush3.bf16.msra.mxu0 %v3276_v18 }
 0x80e   :  { %3100 = vmatprep.subr.bf16.mxu0 %v3277_v28 }
 0x80f   :  { %v3074_v12 = vpop.f32.mrb[32].mxu0 }
 0x810   :  { %v1550_v37 = vpop.f32.mrb[33].mxu0 }
 0x811   :  { %v3075_v15 = vpop.f32.mrb[34].mxu0  ;;  %3101 = vmatpush3.bf16.msra.mxu0 %v3277_v28 }
 0x812   :  { %v1582_v23 = vpack.c.bf16 %v3075_v15, %v3074_v12  ;;  %v1553_v19 = vpop.f32.mrb[35].mxu0  ;;  %3102 = vmatprep.subr.bf16.mxu0 %v3278_v17  ;;  %v4731_v12 = vmax.f32 %v4040_v1, 0.0 }
 0x813   :  { %v1581_v26 = vpack.c.bf16 %v1553_v19, %v1550_v37  ;;  %v4732_v19 = vmax.f32 %v4042_v3, 0.0  ;;  %v4734_v3 = vmax.f32 %v4058_v13, 0.0 }
 0x814   :  { %v1669_v37 = vmul.f32 0.5, %v4731_v12 }
 0x815   :  { %3080 = vmatprep.subr.bf16.mxu1 %v1581_v26  ;;  %3103 = vmatpush3.bf16.msra.mxu0 %v3278_v17 }
 0x816   :  { %3081 = vmatpush3.bf16.msra.mxu1 %v1581_v26  ;;  %v1667_v26 = vmul.f32 0.5, %v4732_v19  ;;  %v3282_v19 = vld [vmem:[%s4663_s20 + $0x18] sm:$0xff]  }
 0x817   :  { %v3078_v48 = vpop.f32.mrb[36].mxu0  ;;  %3082 = vmatprep.subr.bf16.mxu1 %v1582_v23 }
 0x818   :  { %v1566_v44 = vpop.f32.mrb[37].mxu0 }
 0x819   :  { %v3079_v45 = vpop.f32.mrb[38].mxu0 }
 0x81a   :  { %v1584_v30 = vpack.c.bf16 %v3079_v45, %v3078_v48  ;;  %v1569_v31 = vpop.f32.mrb[39].mxu0  ;;  %3083 = vmatpush3.bf16.msra.mxu1 %v1582_v23 }
 0x81b   :  { %v1583_v4 = vpack.c.bf16 %v1569_v31, %v1566_v44 }
 0x81d   :  { %3084 = vmatprep.subr.bf16.mxu1 %v1583_v4 }
 0x81e   :  { %3085 = vmatpush3.bf16.msra.mxu1 %v1583_v4 }
 0x81f   :  { %3086 = vmatprep.subr.bf16.mxu1 %v1584_v30 }
 0x822   :  { %3087 = vmatpush3.bf16.msra.mxu1 %v1584_v30 }
 0x825   :  { %3089 = vmatmul.mubr.msk.bf16.vlgmr.msra.gmra.mrb[48].mxu1 %vm444_vm0, %v4210_v5 }
 0x826   :  { %3092 = vmatprep.mubr.msk.bf16.mxu1 %vm444_vm0, %v4215_v27 }
 0x82d   :  { %3093 = vmatmul.mubr.msk.bf16.gmra.mrb[52].mxu1 %vm444_vm0, %v4224_v6 }
 0x82e   :  { %3120 = vmatprep.mubr.msk.bf16.mxu1 %vm444_vm0, %v4203_v7 }
 0x8f8   :  { %v3090_v29 = vpop.f32.mrb[48].mxu1 }
 0x8f9   :  { %v1652_v36 = vmax.f32 %v3090_v29, 0.0  ;;  %v1619_v20 = vpop.f32.mrb[49].mxu1  ;;  %v4733_v29 = vmax.f32 %v4056_v11, 0.0  ;;  %v4736_v11 = vmax.f32 %v4066_v21, 0.0  ;;  %v3281_v21 = vld [vmem:[%s4663_s20 + $0x10] sm:$0xff]  }
 0x8fa   :  { %v1650_v47 = vmax.f32 %v1619_v20, 0.0  ;;  %v3091_v56 = vpop.f32.mrb[50].mxu1 }
 0x8fb   :  { %v1660_v24 = vmul.f32 0.5, %v1652_v36  ;;  %v1653_v35 = vmax.f32 %v3091_v56, 0.0  ;;  %v1622_v25 = vpop.f32.mrb[51].mxu1  ;;  %v1672_v1 = vmul.f32 0.5, %v4733_v29  ;;  %v1670_v56 = vmul.f32 0.5, %v4734_v3 }
 0x8fc   :  { %v1658_v41 = vmul.f32 0.5, %v1650_v47  ;;  %v1651_v34 = vmax.f32 %v1622_v25, 0.0 }
 0x8fd   :  { %v1676_v15 = vadd.f32 %v1668_v40, %v1660_v24  ;;  %v1661_v23 = vmul.f32 0.5, %v1653_v35  ;;  %v4735_v24 = vmax.f32 %v4062_v16, 0.0  ;;  %v3279_v16 = vld [vmem:[%s4663_s20] sm:$0xff]  }
 0x8fe   :  { %v1674_v48 = vadd.f32 %v1666_v38, %v1658_v41  ;;  %v1659_v44 = vmul.f32 0.5, %v1651_v34  ;;  %v1671_v38 = vmul.f32 0.5, %v4736_v11  ;;  %3128 = vmatprep.subr.bf16.mxu0 %v3279_v16 }
 0x8ff   :  { %v1677_v61 = vadd.f32 %v1669_v37, %v1661_v23  ;;  %v1673_v35 = vmul.f32 0.5, %v4735_v24  ;;  %v3280_v23 = vld [vmem:[%s4663_s20 + $0x8] sm:$0xff]   ;;  %v4737_v24 = vmax.f32 %v4086_v42, 0.0 }
 0x900   :  { %v1675_v45 = vadd.f32 %v1667_v26, %v1659_v44  ;;  %v3094_v30 = vpop.f32.mrb[52].mxu1  ;;  %v3283_v26 = vld [vmem:[%s4663_s20 + $0x20] sm:$0xff]  }
 0x901   :  { %v1683_v31 = vpack.c.bf16 %v1677_v61, %v1676_v15  ;;  %v1656_v4 = vmax.f32 %v3094_v30, 0.0  ;;  %v1635_v18 = vpop.f32.mrb[53].mxu1 }
 0x902   :  { %v1682_v63 = vpack.c.bf16 %v1675_v45, %v1674_v48  ;;  %v1654_v28 = vmax.f32 %v1635_v18, 0.0  ;;  %v3095_v17 = vpop.f32.mrb[54].mxu1 }
 0x903   :  { %v1664_v36 = vmul.f32 0.5, %v1656_v4  ;;  %v1657_v20 = vmax.f32 %v3095_v17, 0.0  ;;  %v1638_v47 = vpop.f32.mrb[55].mxu1 }
 0x904   :  { %v1662_v22 = vmul.f32 0.5, %v1654_v28  ;;  %v1655_v40 = vmax.f32 %v1638_v47, 0.0  ;;  %3104 = vmatprep.mubr.msk.bf16.mxu0 %vm444_vm0, %v1682_v63 }
 0x905   :  { %v1680_v25 = vadd.f32 %v1672_v1, %v1664_v36  ;;  %v1665_v59 = vmul.f32 0.5, %v1657_v20  ;;  %3105 = vmatmul.mubr.msk.bf16.vlgmr.msra.gmra.mrb[40].mxu0 %vm444_vm0, %v1683_v31  ;;  %v3284_v1 = vld [vmem:[%s4663_s20 + $0x28] sm:$0xff]   ;;  %v3285_v36 = vld [vmem:[%s4663_s20 + $0x30] sm:$0xff]   ;;  %v3286_v20 = vld [vmem:[%s4663_s20 + $0x38] sm:$0xff]  }
 0x906   :  { %v1678_v41 = vadd.f32 %v1670_v56, %v1662_v22  ;;  %v1663_v34 = vmul.f32 0.5, %v1655_v40  ;;  %3129 = vmatpush3.bf16.msra.mxu0 %v3279_v16 }
 0x907   :  { %v1681_v12 = vadd.f32 %v1673_v35, %v1665_v59  ;;  %3130 = vmatprep.subr.bf16.mxu0 %v3280_v23  ;;  %v1882_v35 = vmul.f32 0.5, %v4737_v24 }
 0x908   :  { %v1679_v37 = vadd.f32 %v1671_v38, %v1663_v34  ;;  %v4738_v38 = vmax.f32 %v4088_v46, 0.0 }
 0x909   :  { %v1685_v13 = vpack.c.bf16 %v1681_v12, %v1680_v25 }
 0x90a   :  { %v1684_v15 = vpack.c.bf16 %v1679_v37, %v1678_v41  ;;  %3131 = vmatpush3.bf16.msra.mxu0 %v3280_v23  ;;  %v1880_v41 = vmul.f32 0.5, %v4738_v38  ;;  %v4739_v37 = vmax.f32 %v4090_v50, 0.0  ;;  %v4740_v23 = vmax.f32 %v4092_v52, 0.0 }
 0x90b   :  { %3132 = vmatprep.subr.bf16.mxu0 %v3281_v21  ;;  %v4742_v52 = vmax.f32 %v4108_v0, 0.0 }
 0x90c   :  { %3108 = vmatprep.mubr.msk.bf16.mxu0 %vm444_vm0, %v1684_v15 }
 0x90d   :  { %3109 = vmatmul.mubr.msk.bf16.gmra.mrb[44].mxu0 %vm444_vm0, %v1685_v13  ;;  %v1883_v13 = vmul.f32 0.5, %v4739_v37 }
 0x90e   :  { %3133 = vmatpush3.bf16.msra.mxu0 %v3281_v21  ;;  %v1881_v21 = vmul.f32 0.5, %v4740_v23 }
 0x90f   :  { %3134 = vmatprep.subr.bf16.mxu0 %v3282_v19 }
 0x912   :  { %3135 = vmatpush3.bf16.msra.mxu0 %v3282_v19 }
 0x913   :  { %3136 = vmatprep.subr.bf16.mxu0 %v3283_v26 }
 0x916   :  { %3137 = vmatpush3.bf16.msra.mxu0 %v3283_v26 }
 0x917   :  { %3138 = vmatprep.subr.bf16.mxu0 %v3284_v1 }
 0x91a   :  { %3139 = vmatpush3.bf16.msra.mxu0 %v3284_v1 }
 0x91b   :  { %3140 = vmatprep.subr.bf16.mxu0 %v3285_v36 }
 0x91e   :  { %3141 = vmatpush3.bf16.msra.mxu0 %v3285_v36 }
 0x91f   :  { %3142 = vmatprep.subr.bf16.mxu0 %v3286_v20 }
 0x922   :  { %3143 = vmatpush3.bf16.msra.mxu0 %v3286_v20  ;;  %v4743_v20 = vmax.f32 %v4110_v8, 0.0 }
 0x9d8   :  { %v3106_v48 = vpop.f32.mrb[40].mxu0 }
 0x9d9   :  { %v1764_v44 = vpop.f32.mrb[41].mxu0 }
 0x9da   :  { %v3107_v61 = vpop.f32.mrb[42].mxu0 }
 0x9db   :  { %v1796_v45 = vpack.c.bf16 %v3107_v61, %v3106_v48  ;;  %v1767_v30 = vpop.f32.mrb[43].mxu0 }
 0x9dc   :  { %v1795_v31 = vpack.c.bf16 %v1767_v30, %v1764_v44 }
 0x9de   :  { %3112 = vmatprep.subr.bf16.mxu1 %v1795_v31 }
 0x9df   :  { %3113 = vmatpush3.bf16.msra.mxu1 %v1795_v31 }
 0x9e0   :  { %v3110_v4 = vpop.f32.mrb[44].mxu0  ;;  %3114 = vmatprep.subr.bf16.mxu1 %v1796_v45 }
 0x9e1   :  { %v1780_v18 = vpop.f32.mrb[45].mxu0 }
 0x9e2   :  { %v3111_v63 = vpop.f32.mrb[46].mxu0 }
 0x9e3   :  { %v1798_v28 = vpack.c.bf16 %v3111_v63, %v3110_v4  ;;  %v1783_v17 = vpop.f32.mrb[47].mxu0  ;;  %3115 = vmatpush3.bf16.msra.mxu1 %v1796_v45 }
 0x9e4   :  { %v1797_v29 = vpack.c.bf16 %v1783_v17, %v1780_v18  ;;  %v4741_v18 = vmax.f32 %v4106_v60, 0.0 }
 0x9e6   :  { %3116 = vmatprep.subr.bf16.mxu1 %v1797_v29  ;;  %v1886_v50 = vmul.f32 0.5, %v4741_v18  ;;  %v2117_v18 = vmul.f32 0.5, %v4139_v9 }
 0x9e7   :  { %3117 = vmatpush3.bf16.msra.mxu1 %v1797_v29  ;;  %v1884_v29 = vmul.f32 0.5, %v4742_v52 }
 0x9e8   :  { %3118 = vmatprep.subr.bf16.mxu1 %v1798_v28 }
 0x9eb   :  { %3119 = vmatpush3.bf16.msra.mxu1 %v1798_v28 }
 0x9ee   :  { %3121 = vmatmul.mubr.msk.bf16.vlgmr.msra.gmra.mrb[56].mxu1 %vm444_vm0, %v4210_v5 }
 0x9ef   :  { %3124 = vmatprep.mubr.msk.bf16.mxu1 %vm444_vm0, %v4215_v27 }
 0x9f6   :  { %3125 = vmatmul.mubr.msk.bf16.gmra.mrb[60].mxu1 %vm444_vm0, %v4224_v6 }
 0x9f7   :  { %3160 = vmatprep.mubr.msk.bf16.mxu1 %vm444_vm0, %v4203_v7 }
 0xac1   :  { %v3122_v47 = vpop.f32.mrb[56].mxu1 }
 0xac2   :  { %v1866_v3 = vmax.f32 %v3122_v47, 0.0  ;;  %v1833_v56 = vpop.f32.mrb[57].mxu1  ;;  %v1887_v47 = vmul.f32 0.5, %v4743_v20 }
 0xac3   :  { %v1864_v22 = vmax.f32 %v1833_v56, 0.0  ;;  %v3123_v40 = vpop.f32.mrb[58].mxu1 }
 0xac4   :  { %v1874_v25 = vmul.f32 0.5, %v1866_v3  ;;  %v1867_v59 = vmax.f32 %v3123_v40, 0.0  ;;  %v1836_v11 = vpop.f32.mrb[59].mxu1 }
 0xac5   :  { %v1872_v34 = vmul.f32 0.5, %v1864_v22  ;;  %v1865_v12 = vmax.f32 %v1836_v11, 0.0  ;;  %v4744_v22 = vmax.f32 %v4112_v10, 0.0 }
 0xac6   :  { %v1890_v15 = vadd.f32 %v1882_v35, %v1874_v25  ;;  %v1875_v16 = vmul.f32 0.5, %v1867_v59 }
 0xac7   :  { %v1888_v19 = vadd.f32 %v1880_v41, %v1872_v34  ;;  %v1873_v26 = vmul.f32 0.5, %v1865_v12  ;;  %v1885_v40 = vmul.f32 0.5, %v4744_v22 }
 0xac8   :  { %v1891_v42 = vadd.f32 %v1883_v13, %v1875_v16 }
 0xac9   :  { %v1889_v48 = vadd.f32 %v1881_v21, %v1873_v26  ;;  %v3126_v44 = vpop.f32.mrb[60].mxu1 }
 0xaca   :  { %v1897_v61 = vpack.c.bf16 %v1891_v42, %v1890_v15  ;;  %v1870_v45 = vmax.f32 %v3126_v44, 0.0  ;;  %v1849_v30 = vpop.f32.mrb[61].mxu1 }
 0xacb   :  { %v1868_v46 = vmax.f32 %v1849_v30, 0.0  ;;  %v3127_v31 = vpop.f32.mrb[62].mxu1  ;;  %v1896_v4 = vpack.c.bf16 %v1889_v48, %v1888_v19 }
 0xacc   :  { %v1878_v63 = vmul.f32 0.5, %v1870_v45  ;;  %v1871_v28 = vmax.f32 %v3127_v31, 0.0  ;;  %v1852_v17 = vpop.f32.mrb[63].mxu1  ;;  %v2116_v31 = vmul.f32 0.5, %v4144_v49 }
 0xacd   :  { %v1876_v1 = vmul.f32 0.5, %v1868_v46  ;;  %v1869_v36 = vmax.f32 %v1852_v17, 0.0  ;;  %3144 = vmatprep.mubr.bf16.mxu0 %v1896_v4 }
 0xace   :  { %v1894_v3 = vadd.f32 %v1886_v50, %v1878_v63  ;;  %v1879_v56 = vmul.f32 0.5, %v1871_v28  ;;  %3145 = vmatmul.mubr.bf16.vlgmr.msra.gmra.mrb[48].mxu0 %v1897_v61  ;;  %v2114_v50 = vmul.f32 0.5, %v4129_v51  ;;  %v2115_v28 = vmul.f32 0.5, %v4131_v57 }
 0xacf   :  { %v1892_v60 = vadd.f32 %v1884_v29, %v1876_v1  ;;  %v1877_v24 = vmul.f32 0.5, %v1869_v36 }
 0xad0   :  { %v1895_v35 = vadd.f32 %v1887_v47, %v1879_v56 }
 0xad1   :  { %v1893_v25 = vadd.f32 %v1885_v40, %v1877_v24 }
 0xad2   :  { %v1899_v59 = vpack.c.bf16 %v1895_v35, %v1894_v3 }
 0xad3   :  { %v1898_v11 = vpack.c.bf16 %v1893_v25, %v1892_v60 }
 0xad5   :  { %3148 = vmatprep.mubr.bf16.mxu0 %v1898_v11  ;;  %v2120_v11 = vmul.f32 0.5, %v4170_v39 }
 0xad6   :  { %3149 = vmatmul.mubr.bf16.gmra.mrb[52].mxu0 %v1899_v59 }
 0xad7   :  { %3186 = vmatprep.mubr.msk.bf16.mxu0 %vm444_vm0, %v4203_v7  ;;  %v3287_v7 = vld [vmem:[%s4664_s21] sm:$0xff]   ;;  %s3646_s21 = smov 16  }
 0xba1   :  { %v3146_v0 = vpop.f32.mrb[48].mxu0 }
 0xba2   :  { %v1998_v8 = vpop.f32.mrb[49].mxu0 }
 0xba3   :  { %v3147_v38 = vpop.f32.mrb[50].mxu0 }
 0xba4   :  { %v2030_v41 = vpack.c.bf16 %v3147_v38, %v3146_v0  ;;  %v2001_v34 = vpop.f32.mrb[51].mxu0  ;;  %v2118_v38 = vmul.f32 0.5, %v4157_v58 }
 0xba5   :  { %v2029_v12 = vpack.c.bf16 %v2001_v34, %v1998_v8  ;;  %v2121_v8 = vmul.f32 0.5, %v4165_v32  ;;  %v2119_v34 = vmul.f32 0.5, %v4152_v43 }
 0xba7   :  { %3152 = vmatprep.subr.bf16.mxu1 %v2029_v12 }
 0xba8   :  { %3153 = vmatpush3.bf16.msra.mxu1 %v2029_v12 }
 0xba9   :  { %v3150_v10 = vpop.f32.mrb[52].mxu0  ;;  %3154 = vmatprep.subr.bf16.mxu1 %v2030_v41 }
 0xbaa   :  { %v2014_v37 = vpop.f32.mrb[53].mxu0 }
 0xbab   :  { %v3151_v13 = vpop.f32.mrb[54].mxu0 }
 0xbac   :  { %v2032_v15 = vpack.c.bf16 %v3151_v13, %v3150_v10  ;;  %v2017_v16 = vpop.f32.mrb[55].mxu0  ;;  %3155 = vmatpush3.bf16.msra.mxu1 %v2030_v41 }
 0xbad   :  { %v2031_v23 = vpack.c.bf16 %v2017_v16, %v2014_v37 }
 0xbaf   :  { %3156 = vmatprep.subr.bf16.mxu1 %v2031_v23 }
 0xbb0   :  { %3157 = vmatpush3.bf16.msra.mxu1 %v2031_v23 }
 0xbb1   :  { %3158 = vmatprep.subr.bf16.mxu1 %v2032_v15 }
 0xbb4   :  { %3159 = vmatpush3.bf16.msra.mxu1 %v2032_v15 }
 0xbb5   :  { %3168 = vmatprep.subr.bf16.mxu1 %v3287_v7 }
 0xbb7   :  { %3161 = vmatmul.mubr.msk.bf16.vlgmr.msra.gmra.mrb[64].mxu1 %vm444_vm0, %v4210_v5 }
 0xbb8   :  { %3164 = vmatprep.mubr.msk.bf16.mxu1 %vm444_vm0, %v4215_v27  ;;  %3169 = vmatpush3.bf16.msra.mxu1 %v3287_v7 }
 0xbbf   :  { %3165 = vmatmul.mubr.msk.bf16.gmra.mrb[68].mxu1 %vm444_vm0, %v4224_v6 }
 0xc8a   :  { %v3162_v21 = vpop.f32.mrb[64].mxu1 }
 0xc8b   :  { %v2100_v19 = vmax.f32 %v3162_v21, 0.0  ;;  %v2067_v26 = vpop.f32.mrb[65].mxu1 }
 0xc8c   :  { %v2098_v42 = vmax.f32 %v2067_v26, 0.0  ;;  %v3163_v48 = vpop.f32.mrb[66].mxu1 }
 0xc8d   :  { %v2108_v44 = vmul.f32 0.5, %v2100_v19  ;;  %v2101_v61 = vmax.f32 %v3163_v48, 0.0  ;;  %v2070_v45 = vpop.f32.mrb[67].mxu1 }
 0xc8e   :  { %v2106_v30 = vmul.f32 0.5, %v2098_v42  ;;  %v2099_v46 = vmax.f32 %v2070_v45, 0.0 }
 0xc8f   :  { %v2109_v4 = vmul.f32 0.5, %v2101_v61  ;;  %v2124_v17 = vadd.f32 %v2116_v31, %v2108_v44 }
 0xc90   :  { %v2107_v63 = vmul.f32 0.5, %v2099_v46  ;;  %v2122_v29 = vadd.f32 %v2114_v50, %v2106_v30 }
 0xc91   :  { %v2125_v52 = vadd.f32 %v2117_v18, %v2109_v4 }
 0xc92   :  { %v2123_v1 = vadd.f32 %v2115_v28, %v2107_v63  ;;  %v3166_v36 = vpop.f32.mrb[68].mxu1 }
 0xc93   :  { %v2131_v20 = vpack.c.bf16 %v2125_v52, %v2124_v17  ;;  %v2104_v47 = vmax.f32 %v3166_v36, 0.0  ;;  %v2083_v3 = vpop.f32.mrb[69].mxu1 }
 0xc94   :  { %v2130_v56 = vpack.c.bf16 %v2123_v1, %v2122_v29  ;;  %v2102_v22 = vmax.f32 %v2083_v3, 0.0  ;;  %v3167_v40 = vpop.f32.mrb[70].mxu1 }
 0xc95   :  { %v2112_v60 = vmul.f32 0.5, %v2104_v47  ;;  %v2105_v24 = vmax.f32 %v3167_v40, 0.0  ;;  %v2086_v35 = vpop.f32.mrb[71].mxu1  ;;  %v2378_v40 = vmul.f32 %v4131_v57, %v4131_v57 }
 0xc96   :  { %v2110_v25 = vmul.f32 0.5, %v2102_v22  ;;  %v2103_v59 = vmax.f32 %v2086_v35, 0.0  ;;  %3170 = vmatprep.mubr.msk.bf16.mxu1 %vm814_vm1, %v2130_v56  ;;  %v2379_v56 = vmul.f32 %v4144_v49, %v4144_v49 }
 0xc97   :  { %v2113_v0 = vmul.f32 0.5, %v2105_v24  ;;  %3171 = vmatmul.mubr.msk.bf16.vlgmr.msra.gmra.mrb[72].mxu1 %vm814_vm1, %v2131_v20  ;;  %v2128_v12 = vadd.f32 %v2120_v11, %v2112_v60  ;;  %v2377_v20 = vmul.f32 %v4129_v51, %v4129_v51  ;;  %v2381_v24 = vmul.f32 %v4157_v58, %v4157_v58 }
 0xc98   :  { %v2111_v41 = vmul.f32 0.5, %v2103_v59  ;;  %v2126_v37 = vadd.f32 %v2118_v38, %v2110_v25  ;;  %v2391_v60 = vsel %vm814_vm1, %v2379_v56, 0.0  ;;  %v2388_v35 = vsel %vm814_vm1, %v2378_v40, 0.0 }
 0xc99   :  { %v2129_v10 = vadd.f32 %v2121_v8, %v2113_v0  ;;  %v2385_v3 = vsel %vm814_vm1, %v2377_v20, 0.0  ;;  %v2380_v25 = vmul.f32 %v4139_v9, %v4139_v9  ;;  %v2397_v59 = vsel %vm814_vm1, %v2381_v24, 0.0 }
 0xc9a   :  { %v2127_v13 = vadd.f32 %v2119_v34, %v2111_v41  ;;  %v2383_v11 = vmul.f32 %v4170_v39, %v4170_v39  ;;  %v2382_v8 = vmul.f32 %v4152_v43, %v4152_v43  ;;  %v2384_v34 = vmul.f32 %v4165_v32, %v4165_v32 }
 0xc9b   :  { %v2133_v15 = vpack.c.bf16 %v2129_v10, %v2128_v12  ;;  %v2394_v0 = vsel %vm814_vm1, %v2380_v25, 0.0 }
 0xc9c   :  { %v2132_v16 = vpack.c.bf16 %v2127_v13, %v2126_v37  ;;  %v2403_v38 = vsel %vm814_vm1, %v2383_v11, 0.0  ;;  %v2400_v41 = vsel %vm814_vm1, %v2382_v8, 0.0  ;;  %v2406_v12 = vsel %vm814_vm1, %v2384_v34, 0.0 }
 0xc9d   :  { %v2428_v11 = vmul.f32 2.0, %v4192_v33 }
 0xc9e   :  { %3174 = vmatprep.mubr.msk.bf16.mxu1 %vm814_vm1, %v2132_v16 }
 0xc9f   :  { %3175 = vmatmul.mubr.msk.bf16.gmra.mrb[76].mxu1 %vm814_vm1, %v2133_v15 }
 0xca0   :  { %3190 = vmatprep.mubr.msk.bf16.mxu1 %vm444_vm0, %v4215_v27 }
 0xd6a   :  { %v3172_v23 = vpop.f32.mrb[72].mxu1 }
 0xd6b   :  { %v2188_v7 = vpop.f32.mrb[73].mxu1 }
 0xd6c   :  { %v3173_v21 = vpop.f32.mrb[74].mxu1 }
 0xd6d   :  { %v2220_v19 = vpack.c.bf16 %v3173_v21, %v3172_v23  ;;  %v2191_v26 = vpop.f32.mrb[75].mxu1 }
 0xd6e   :  { %v2219_v42 = vpack.c.bf16 %v2191_v26, %v2188_v7 }
 0xd70   :  { %3178 = vmatprep.subr.bf16.mxu0 %v2219_v42  ;;  %3194 = vmatprep.subr.bf16.mxu1 %v2219_v42 }
 0xd71   :  { %3179 = vmatpush3.bf16.msra.mxu0 %v2219_v42  ;;  %3198 = vmatpush3.bf16.msra.mxu1 %v2219_v42 }
 0xd72   :  { %v3176_v48 = vpop.f32.mrb[76].mxu1  ;;  %3180 = vmatprep.subr.bf16.mxu0 %v2220_v19  ;;  %3195 = vmatprep.subr.bf16.mxu1 %v2220_v19 }
 0xd73   :  { %v2204_v44 = vpop.f32.mrb[77].mxu1 }
 0xd74   :  { %v3177_v61 = vpop.f32.mrb[78].mxu1 }
 0xd75   :  { %v2222_v45 = vpack.c.bf16 %v3177_v61, %v3176_v48  ;;  %v2207_v30 = vpop.f32.mrb[79].mxu1  ;;  %3181 = vmatpush3.bf16.msra.mxu0 %v2220_v19  ;;  %3199 = vmatpush3.bf16.msra.mxu1 %v2220_v19 }
 0xd76   :  { %v2221_v27 = vpack.c.bf16 %v2207_v30, %v2204_v44 }
 0xd78   :  { %3182 = vmatprep.subr.bf16.mxu0 %v2221_v27  ;;  %3196 = vmatprep.subr.bf16.mxu1 %v2221_v27 }
 0xd79   :  { %3183 = vmatpush3.bf16.msra.mxu0 %v2221_v27  ;;  %3200 = vmatpush3.bf16.msra.mxu1 %v2221_v27 }
 0xd7a   :  { %3184 = vmatprep.subr.bf16.mxu0 %v2222_v45  ;;  %3197 = vmatprep.subr.bf16.mxu1 %v2222_v45 }
 0xd7d   :  { %3185 = vmatpush3.bf16.msra.mxu0 %v2222_v45  ;;  %3201 = vmatpush3.bf16.msra.mxu1 %v2222_v45 }
 0xd80   :  { %3187 = vmatmul.mubr.msk.bf16.vlgmr.msra.gmra.mrb[56].mxu0 %vm444_vm0, %v4210_v5  ;;  %3191 = vmatmul.mubr.msk.bf16.vlgmr.msra.gmra.mrb[80].mxu1 %vm444_vm0, %v4224_v6 }
 0xe53   :  { %v3188_v46 = vpop.f32.mrb[56].mxu0  ;;  %v4414_v31 = vpop.f32.mrb[80].mxu1 }
 0xe54   :  { %v2257_v4 = vpop.f32.mrb[57].mxu0  ;;  %v2273_v18 = vpop.f32.mrb[81].mxu1  ;;  %v2295_v50 = vsel %vm2288_vm2, %v3188_v46, -inf  ;;  %v2307_v36 = vsel %vm2288_vm2, %v4414_v31, -inf }
 0xe55   :  { %2296 = vmax.xlane.f32.xlu0 %v2295_v50  ;;  %v3189_v63 = vpop.f32.mrb[58].mxu0  ;;  %v2301_v28 = vsel %vm2288_vm2, %v2273_v18, -inf  ;;  %v4418_v17 = vpop.f32.mrb[82].mxu1  ;;  %v2289_v6 = vsel %vm2288_vm2, %v2257_v4, -inf }
 0xe56   :  { %2302 = vmax.xlane.f32.xlu1 %v2301_v28  ;;  %v2260_v52 = vpop.f32.mrb[59].mxu0  ;;  %v4420_v5 = vpop.f32.mrb[83].mxu1  ;;  %v2298_v1 = vsel %vm2288_vm2, %v3189_v63, -inf  ;;  %v2310_v22 = vsel %vm2288_vm2, %v4418_v17, -inf }
 0xe57   :  { %v2292_v29 = vsel %vm2288_vm2, %v2260_v52, -inf  ;;  %v2304_v47 = vsel %vm2288_vm2, %v4420_v5, -inf }
 0xe59   :  { %2290 = vmax.xlane.f32.xlu0 %v2289_v6 }
 0xe5a   :  { %2293 = vmax.xlane.f32.xlu1 %v2292_v29 }
 0xe5d   :  { %2299 = vmax.xlane.f32.xlu0 %v2298_v1 }
 0xe5e   :  { %2308 = vmax.xlane.f32.xlu1 %v2307_v36 }
 0xe61   :  { %2305 = vmax.xlane.f32.xlu0 %v2304_v47 }
 0xe62   :  { %2386 = vadd.xlane.f32.xlu1 %v2385_v3 }
 0xe65   :  { %2311 = vmax.xlane.f32.xlu0 %v2310_v22 }
 0xe66   :  { %2392 = vadd.xlane.f32.xlu1 %v2391_v60 }
 0xe69   :  { %2389 = vadd.xlane.f32.xlu0 %v2388_v35 }
 0xe6a   :  { %2398 = vadd.xlane.f32.xlu1 %v2397_v59 }
 0xe6d   :  { %2395 = vadd.xlane.f32.xlu0 %v2394_v0 }
 0xe6e   :  { %2404 = vadd.xlane.f32.xlu1 %v2403_v38 }
 0xe71   :  { %2401 = vadd.xlane.f32.xlu0 %v2400_v41 }
 0xe75   :  { %2407 = vadd.xlane.f32.xlu0 %v2406_v12 }
 0xee2   :  { %v2297_v10 = vpop.xlane.xlu0 %2296 }
 0xee3   :  { %v2315_v37 = vsub.f32 %v3188_v46, %v2297_v10  ;;  %v2303_v13 = vpop.xlane.xlu1 %2302  ;;  %v4456_v46 = vld [vmem:[#allocation19] ss:$0 sm:$0xff] }
 0xee4   :  { %v2317_v16 = vsub.f32 %v2273_v18, %v2303_v13 }
 0xee5   :  { %v2325_v15 = vmul.f32 1.442695, %v2315_v37 }
 0xee6   :  { %v2291_v23 = vpop.xlane.xlu0 %2290  ;;  %v2329_v26 = vmul.f32 1.442695, %v2317_v16 }
 0xee7   :  { %3288 = vpow2.f32 %v2325_v15  ;;  %v2313_v7 = vsub.f32 %v2257_v4, %v2291_v23  ;;  %v2294_v21 = vpop.xlane.xlu1 %2293  ;;  %v2427_v15 = vmul.f32 2.0, %v4190_v62 }
 0xee8   :  { %v2314_v19 = vsub.f32 %v2260_v52, %v2294_v21  ;;  %v2424_v52 = vmul.f32 2.0, %v4184_v2  ;;  %v2430_v21 = vmul.f32 2.0, %v4196_v55 }
 0xee9   :  { %v2321_v42 = vmul.f32 1.442695, %v2313_v7 }
 0xeea   :  { %v2300_v48 = vpop.xlane.xlu0 %2299  ;;  %v2323_v45 = vmul.f32 1.442695, %v2314_v19 }
 0xeeb   :  { %3290 = vpow2.f32 %v2321_v42  ;;  %v2316_v44 = vsub.f32 %v3189_v63, %v2300_v48  ;;  %v2309_v61 = vpop.xlane.xlu1 %2308 }
 0xeec   :  { %v2319_v30 = vsub.f32 %v4414_v31, %v2309_v61  ;;  %3292 = vpow2.f32 %v2329_v26 }
 0xeed   :  { %v2327_v27 = vmul.f32 1.442695, %v2316_v44 }
 0xeee   :  { %v2333_v50 = vmul.f32 1.442695, %v2319_v30  ;;  %v2306_v18 = vpop.xlane.xlu0 %2305 }
 0xeef   :  { %3294 = vpow2.f32 %v2327_v27  ;;  %v2318_v4 = vsub.f32 %v4420_v5, %v2306_v18  ;;  %v2387_v28 = vpop.xlane.xlu1 %2386  ;;  %v2426_v5 = vmul.f32 2.0, %v4188_v53 }
 0xef0   :  { %3296 = vpow2.f32 %v2323_v45  ;;  %v2416_v6 = vadd.f32 %v4456_v46, %v2387_v28 }
 0xef1   :  { %v4461_v63 = vpop.eup %3288  ;;  %3298 = vpow2.f32 %v2333_v50  ;;  %v2331_v29 = vmul.f32 1.442695, %v2318_v4  ;;  %v2429_v50 = vmul.f32 2.0, %v4194_v54 }
 0xef2   :  { %v2432_v31 = vsub.f32 %v2416_v6, %v2424_v52  ;;  %v2312_v1 = vpop.xlane.xlu0 %2311  ;;  %v2343_v36 = vsel %vm2288_vm2, %v4461_v63, 0.0 }
 0xef3   :  { %v2320_v20 = vsub.f32 %v4418_v17, %v2312_v1  ;;  %2344 = vadd.xlane.f32.xlu1 %v2343_v36  ;;  %v2393_v47 = vpop.xlane.xlu1 %2392  ;;  %3300 = vpow2.f32 %v2331_v29  ;;  %v2425_v17 = vmul.f32 2.0, %v4186_v14  ;;  %v4745_v29 = vld [vmem:[#allocation28_spill] sm:$0xff] }
 0xef4   :  { %v2440_v3 = vmax.f32 %v2432_v31, 0.0  ;;  %v2418_v2 = vadd.f32 %v4456_v46, %v2393_v47  ;;  %v2431_v31 = vmul.f32 2.0, %v4745_v29 }
 0xef5   :  { %v4468_v56 = vpop.eup %3290  ;;  %v2335_v22 = vmul.f32 1.442695, %v2320_v20 }
 0xef6   :  { %v2448_v40 = vadd.f32 1.0, %v2440_v3  ;;  %v2434_v60 = vsub.f32 %v2418_v2, %v2426_v5  ;;  %v2390_v24 = vpop.xlane.xlu0 %2389  ;;  %v2337_v35 = vsel %vm2288_vm2, %v4468_v56, 0.0  ;;  %v4472_v25 = vpop.eup %3292 }
 0xef7   :  { %v2417_v59 = vadd.f32 %v4456_v46, %v2390_v24  ;;  %2338 = vadd.xlane.f32.xlu1 %v2337_v35  ;;  %v2399_v53 = vpop.xlane.xlu1 %2398  ;;  %v2349_v13 = vsel %vm2288_vm2, %v4472_v25, 0.0 }
 0xef8   :  { %3302 = vrcp.f32 %v2448_v40  ;;  %v2442_v0 = vmax.f32 %v2434_v60, 0.0  ;;  %v2420_v8 = vadd.f32 %v4456_v46, %v2399_v53 }
 0xef9   :  { %v4478_v38 = vpop.eup %3294  ;;  %3304 = vpow2.f32 %v2335_v22  ;;  %v2433_v41 = vsub.f32 %v2417_v59, %v2425_v17 }
 0xefa   :  { %v4480_v34 = vpop.eup %3296  ;;  %v2450_v12 = vadd.f32 1.0, %v2442_v0  ;;  %v2436_v10 = vsub.f32 %v2420_v8, %v2428_v11  ;;  %v2396_v37 = vpop.xlane.xlu0 %2395  ;;  %v2346_v14 = vsel %vm2288_vm2, %v4478_v38, 0.0 }
 0xefb   :  { %v4486_v33 = vpop.eup %3298  ;;  %v2441_v16 = vmax.f32 %v2433_v41, 0.0  ;;  %v2419_v23 = vadd.f32 %v4456_v46, %v2396_v37  ;;  %2347 = vadd.xlane.f32.xlu0 %v2346_v14  ;;  %2350 = vadd.xlane.f32.xlu1 %v2349_v13  ;;  %v2405_v7 = vpop.xlane.xlu1 %2404  ;;  %v2340_v62 = vsel %vm2288_vm2, %v4480_v34, 0.0 }
 0xefc   :  { %3306 = vrcp.f32 %v2450_v12  ;;  %v2444_v19 = vmax.f32 %v2436_v10, 0.0  ;;  %v2422_v26 = vadd.f32 %v4456_v46, %v2405_v7  ;;  %v2355_v30 = vsel %vm2288_vm2, %v4486_v33, 0.0 }
 0xefd   :  { %v2449_v42 = vadd.f32 1.0, %v2441_v16  ;;  %v2435_v48 = vsub.f32 %v2419_v23, %v2427_v15  ;;  %v4496_v27 = vpop.eup %3300 }
 0xefe   :  { %v2452_v44 = vadd.f32 1.0, %v2444_v19  ;;  %v2438_v61 = vsub.f32 %v2422_v26, %v2430_v21  ;;  %v2402_v45 = vpop.xlane.xlu0 %2401  ;;  %v2352_v20 = vsel %vm2288_vm2, %v4496_v27, 0.0 }
 0xeff   :  { %3308 = vrcp.f32 %v2449_v42  ;;  %v2443_v55 = vmax.f32 %v2435_v48, 0.0  ;;  %v2421_v18 = vadd.f32 %v4456_v46, %v2402_v45  ;;  %2341 = vadd.xlane.f32.xlu0 %v2340_v62  ;;  %2356 = vadd.xlane.f32.xlu1 %v2355_v30 }
 0xf00   :  { %3310 = vrcp.f32 %v2452_v44  ;;  %v2446_v4 = vmax.f32 %v2438_v61, 0.0 }
 0xf01   :  { %v2451_v28 = vadd.f32 1.0, %v2443_v55  ;;  %v2437_v52 = vsub.f32 %v2421_v18, %v2429_v50 }
 0xf02   :  { %v4500_v6 = vpop.eup %3302  ;;  %v2454_v1 = vadd.f32 1.0, %v2446_v4  ;;  %v2408_v36 = vpop.xlane.xlu0 %2407 }
 0xf03   :  { %v4505_v54 = vpop.eup %3304  ;;  %3312 = vrcp.f32 %v2451_v28  ;;  %v2445_v47 = vmax.f32 %v2437_v52, 0.0  ;;  %v2423_v5 = vadd.f32 %v4456_v46, %v2408_v36  ;;  %2353 = vadd.xlane.f32.xlu0 %v2352_v20  ;;  %v2472_v3 = vsel %vm2288_vm2, %v4500_v6, 0.0 }
 0xf04   :  { %3314 = vrcp.f32 %v2454_v1  ;;  %2473 = vadd.xlane.f32.xlu1 %v2472_v3  ;;  %v2358_v60 = vsel %vm2288_vm2, %v4505_v54, 0.0 }
 0xf05   :  { %v2453_v2 = vadd.f32 1.0, %v2445_v47  ;;  %v2439_v22 = vsub.f32 %v2423_v5, %v2431_v31 }
 0xf06   :  { %v4510_v40 = vpop.eup %3306 }
 0xf07   :  { %3316 = vrcp.f32 %v2453_v2  ;;  %v2447_v24 = vmax.f32 %v2439_v22, 0.0  ;;  %2359 = vadd.xlane.f32.xlu0 %v2358_v60  ;;  %v2478_v35 = vsel %vm2288_vm2, %v4510_v40, 0.0 }
 0xf08   :  { %2479 = vadd.xlane.f32.xlu1 %v2478_v35 }
 0xf09   :  { %v4516_v46 = vpop.eup %3308  ;;  %v2455_v17 = vadd.f32 1.0, %v2447_v24 }
 0xf0a   :  { %v4518_v59 = vpop.eup %3310  ;;  %v2475_v53 = vsel %vm2288_vm2, %v4516_v46, 0.0 }
 0xf0b   :  { %3318 = vrcp.f32 %v2455_v17  ;;  %2476 = vadd.xlane.f32.xlu0 %v2475_v53  ;;  %v2484_v11 = vsel %vm2288_vm2, %v4518_v59, 0.0 }
 0xf0c   :  { %2485 = vadd.xlane.f32.xlu1 %v2484_v11 }
 0xf0d   :  { %v4524_v0 = vpop.eup %3312 }
 0xf0e   :  { %v4526_v8 = vpop.eup %3314  ;;  %v2481_v41 = vsel %vm2288_vm2, %v4524_v0, 0.0 }
 0xf0f   :  { %2482 = vadd.xlane.f32.xlu0 %v2481_v41  ;;  %v2490_v12 = vsel %vm2288_vm2, %v4526_v8, 0.0 }
 0xf10   :  { %2491 = vadd.xlane.f32.xlu1 %v2490_v12 }
 0xf11   :  { %v4532_v10 = vpop.eup %3316 }
 0xf12   :  { %v2487_v37 = vsel %vm2288_vm2, %v4532_v10, 0.0 }
 0xf13   :  { %2488 = vadd.xlane.f32.xlu0 %v2487_v37 }
 0xf15   :  { %v4536_v14 = vpop.eup %3318 }
 0xf16   :  { %v2493_v13 = vsel %vm2288_vm2, %v4536_v14, 0.0 }
 0xf17   :  { %2494 = vadd.xlane.f32.xlu0 %v2493_v13 }
 0xf21   :  { %2562 = vrot.lane.b32.xlu1 %v4131_v57, %s3646_s21 }
 0xf25   :  { %2566 = vrot.lane.b32.xlu1 %v4139_v9, %s3646_s21 }
 0xf29   :  { %2570 = vrot.lane.b32.xlu1 %v4152_v43, %s3646_s21 }
 0xf2d   :  { %2560 = vrot.lane.b32.xlu0 %v4129_v51, %s3646_s21 }
 0xf31   :  { %2564 = vrot.lane.b32.xlu0 %v4144_v49, %s3646_s21 }
 0xf35   :  { %2568 = vrot.lane.b32.xlu0 %v4157_v58, %s3646_s21 }
 0xf80   :  { %v2345_v15 = vpop.xlane.xlu1 %2344 }
 0xf81   :  { %3320 = vrcp.f32 %v2345_v15 }
 0xf84   :  { %v2339_v16 = vpop.xlane.xlu1 %2338 }
 0xf85   :  { %3322 = vrcp.f32 %v2339_v16 }
 0xf88   :  { %v2348_v57 = vpop.xlane.xlu0 %2347  ;;  %v2351_v23 = vpop.xlane.xlu1 %2350 }
 0xf89   :  { %3324 = vrcp.f32 %v2348_v57 }
 0xf8b   :  { %v3321_v9 = vpop.eup %3320 }
 0xf8c   :  { %v2342_v7 = vpop.xlane.xlu0 %2341  ;;  %v2357_v21 = vpop.xlane.xlu1 %2356  ;;  %v2371_v43 = vmul.f32 %v3321_v9, %v4461_v63 }
 0xf8d   :  { %3326 = vrcp.f32 %v2357_v21 }
 0xf8e   :  { %2532 = vrot.lane.b32.xlu1 %v2371_v43, %s3641_s30  ;;  %3328 = vrcp.f32 %v2351_v23 }
 0xf8f   :  { %v3323_v51 = vpop.eup %3322  ;;  %3330 = vrcp.f32 %v2342_v7 }
 0xf90   :  { %v2354_v49 = vpop.xlane.xlu0 %2353  ;;  %v2369_v58 = vmul.f32 %v3323_v51, %v4468_v56 }
 0xf92   :  { %2528 = vrot.lane.b32.xlu1 %v2369_v58, %s3641_s30 }
 0xf93   :  { %v3325_v19 = vpop.eup %3324 }
 0xf94   :  { %v2360_v26 = vpop.xlane.xlu0 %2359  ;;  %v2372_v42 = vmul.f32 %v3325_v19, %v4478_v38 }
 0xf95   :  { %3332 = vrcp.f32 %v2360_v26 }
 0xf96   :  { %2534 = vrot.lane.b32.xlu1 %v2372_v42, %s3641_s30  ;;  %3334 = vrcp.f32 %v2354_v49 }
 0xf97   :  { %v3327_v63 = vpop.eup %3326 }
 0xf98   :  { %v2375_v48 = vmul.f32 %v3327_v63, %v4486_v33  ;;  %v3329_v44 = vpop.eup %3328 }
 0xf99   :  { %v2373_v61 = vmul.f32 %v3329_v44, %v4472_v25  ;;  %v3331_v56 = vpop.eup %3330 }
 0xf9a   :  { %2540 = vrot.lane.b32.xlu0 %v2375_v48, %s3641_s30 }
 0xf9e   :  { %2536 = vrot.lane.b32.xlu0 %v2373_v61, %s3641_s30 }
 0xf9f   :  { %v3333_v45 = vpop.eup %3332 }
 0xfa0   :  { %v2376_v38 = vmul.f32 %v3333_v45, %v4505_v54 }
 0xfa1   :  { %3605 = shalt.err (!%p3602_p8)
}
 0xfa2   :  { %s3606_s9 = scalar_lea.hbm %s4666_s23, 1024 }
 0xfa3   :  { %p3607_p9 = scmp.ne.s32.totalorder %s4666_s23, %s3606_s9  ;;  %p3610_p10 = scmp.lt.u32.totalorder %s3606_s9, %s4666_s23 }
 0xfa5   :  { %p3612_p11 = pnand %p3610_p10, %p3607_p9 }
 0xfa7   :  { %3615 = shalt.err (!%p3612_p11)
}
 0xfa8   :  { %2628 = dma.vmem_to_hbm [thread:$0]  %s2623_s3, 1024, %s4666_s23, [#allocation4], %s3640_s1, %s3640_s1, %s3641_s30   ;;  %v3335_v25 = vpop.eup %3334  ;;  %v2370_v33 = vmul.f32 %v3331_v56, %v4480_v34  ;;  %v2474_v30 = vpop.xlane.xlu1 %2473  ;;  %vm2600_vm3 = vcmask 261120  }
 0xfa9   :  { %2542 = vrot.lane.b32.xlu1 %v2376_v38, %s3641_s30  ;;  %v2374_v62 = vmul.f32 %v3335_v25, %v4496_v27  ;;  %v2477_v55 = vpop.xlane.xlu0 %2476 }
 0xfaa   :  { %2530 = vrot.lane.b32.xlu0 %v2370_v33, %s3641_s30 }
 0xfac   :  { %v2480_v50 = vpop.xlane.xlu1 %2479 }
 0xfad   :  { %2538 = vrot.lane.b32.xlu1 %v2374_v62, %s3641_s30  ;;  %v2483_v4 = vpop.xlane.xlu0 %2482  ;;  %3336 = vrcp.f32 %v2480_v50 }
 0xfae   :  { %2572 = vrot.lane.b32.xlu0 %v4170_v39, %s3646_s21  ;;  %3338 = vrcp.f32 %v2474_v30 }
 0xfaf   :  { %3340 = vrcp.f32 %v2483_v4 }
 0xfb0   :  { %v2486_v18 = vpop.xlane.xlu1 %2485 }
 0xfb1   :  { %2574 = vrot.lane.b32.xlu1 %v4165_v32, %s3646_s21  ;;  %v2489_v28 = vpop.xlane.xlu0 %2488  ;;  %3342 = vrcp.f32 %v2486_v18 }
 0xfb2   :  { %3344 = vrcp.f32 %v2477_v55 }
 0xfb4   :  { %v2492_v34 = vpop.xlane.xlu1 %2491 }
 0xfb5   :  { %v2495_v29 = vpop.xlane.xlu0 %2494  ;;  %3346 = vrcp.f32 %v2492_v34 }
 0xfb6   :  { %3348 = vrcp.f32 %v2489_v28 }
 0xfb7   :  { %v3337_v1 = vpop.eup %3336  ;;  %3350 = vrcp.f32 %v2495_v29 }
 0xfb8   :  { %v2563_v52 = vpop.permute.xlu1 %2562  ;;  %v2506_v39 = vmul.f32 %v3337_v1, %v4510_v40  ;;  %v3339_v20 = vpop.eup %3338 }
 0xfb9   :  { %v2561_v31 = vpop.permute.xlu0 %2560  ;;  %v2504_v2 = vmul.f32 %v3339_v20, %v4500_v6  ;;  %v3341_v22 = vpop.eup %3340 }
 0xfba   :  { %v2507_v17 = vmul.f32 %v3341_v22, %v4524_v0 }
 0xfbb   :  { %v3343_v37 = vpop.eup %3342 }
 0xfbc   :  { %v2567_v27 = vpop.permute.xlu1 %2566  ;;  %v2508_v13 = vmul.f32 %v3343_v37, %v4518_v59  ;;  %v3345_v15 = vpop.eup %3344 }
 0xfbd   :  { %v2565_v54 = vpop.permute.xlu0 %2564  ;;  %v2505_v43 = vmul.f32 %v3345_v15, %v4516_v46 }
 0xfbf   :  { %v3347_v23 = vpop.eup %3346 }
 0xfc0   :  { %v2571_v36 = vpop.permute.xlu1 %2570  ;;  %v3349_v7 = vpop.eup %3348  ;;  %v2510_v19 = vmul.f32 %v3347_v23, %v4526_v8 }
 0xfc1   :  { %v2569_v53 = vpop.permute.xlu0 %2568  ;;  %v3351_v58 = vpop.eup %3350  ;;  %v2509_v42 = vmul.f32 %v3349_v7, %v4532_v10 }
 0xfc2   :  { %v2511_v56 = vmul.f32 %v3351_v58, %v4536_v14 }
0x1000   :  { %v2533_v32 = vpop.permute.xlu1 %2532 }
0x1001   :  { %v2586_v47 = vsel %vm2288_vm2, %v2506_v39, %v2533_v32 }
0x1002   :  { %v2594_v5 = vsel %vm814_vm1, %v2586_v47, %v2565_v54 }
0x1003   :  { %v2603_v3 = vsel %vm2600_vm3, %v2594_v5, 0.0 }
0x1004   :  { %2611 = vst [vmem:[%s4667_s24 + $0x10] sm:$0xff] %v2603_v3  ;;  %v2529_v60 = vpop.permute.xlu1 %2528 }
0x1005   :  { %v2584_v40 = vsel %vm2288_vm2, %v2504_v2, %v2529_v60 }
0x1006   :  { %v2592_v24 = vsel %vm814_vm1, %v2584_v40, %v2561_v31 }
0x1007   :  { %v2601_v35 = vsel %vm2600_vm3, %v2592_v24, 0.0 }
0x1008   :  { %2609 = vst [vmem:[%s4667_s24] sm:$0xff] %v2601_v35  ;;  %v2535_v6 = vpop.permute.xlu1 %2534 }
0x1009   :  { %v2587_v11 = vsel %vm2288_vm2, %v2507_v17, %v2535_v6 }
0x100a   :  { %v2595_v41 = vsel %vm814_vm1, %v2587_v11, %v2567_v27 }
0x100b   :  { %v2604_v12 = vsel %vm2600_vm3, %v2595_v41, 0.0 }
0x100c   :  { %2612 = vst [vmem:[%s4667_s24 + $0x18] sm:$0xff] %v2604_v12  ;;  %v2541_v0 = vpop.permute.xlu0 %2540 }
0x100d   :  { %v2590_v46 = vsel %vm2288_vm2, %v2510_v19, %v2541_v0 }
0x1010   :  { %v2537_v16 = vpop.permute.xlu0 %2536 }
0x1011   :  { %v2588_v57 = vsel %vm2288_vm2, %v2508_v13, %v2537_v16 }
0x1012   :  { %v2596_v9 = vsel %vm814_vm1, %v2588_v57, %v2569_v53 }
0x1013   :  { %v2605_v21 = vsel %vm2600_vm3, %v2596_v9, 0.0 }
0x1014   :  { %2613 = vst [vmem:[%s4667_s24 + $0x20] sm:$0xff] %v2605_v21 }
0x101b   :  { %v2543_v51 = vpop.permute.xlu1 %2542 }
0x101c   :  { %v2531_v49 = vpop.permute.xlu0 %2530  ;;  %v2591_v25 = vsel %vm2288_vm2, %v2511_v56, %v2543_v51 }
0x101d   :  { %v2585_v59 = vsel %vm2288_vm2, %v2505_v43, %v2531_v49 }
0x101e   :  { %v2593_v26 = vsel %vm814_vm1, %v2585_v59, %v2563_v52 }
0x101f   :  { %v2602_v63 = vsel %vm2600_vm3, %v2593_v26, 0.0  ;;  %v2539_v48 = vpop.permute.xlu1 %2538 }
0x1020   :  { %2610 = vst [vmem:[%s4667_s24 + $0x8] sm:$0xff] %v2602_v63  ;;  %v2573_v44 = vpop.permute.xlu0 %2572  ;;  %v2589_v61 = vsel %vm2288_vm2, %v2509_v42, %v2539_v48 }
0x1021   :  { %v2598_v8 = vsel %vm814_vm1, %v2590_v46, %v2573_v44  ;;  %v2597_v45 = vsel %vm814_vm1, %v2589_v61, %v2571_v36 }
0x1022   :  { %v2607_v10 = vsel %vm2600_vm3, %v2598_v8, 0.0  ;;  %v2606_v38 = vsel %vm2600_vm3, %v2597_v45, 0.0 }
0x1023   :  { %2615 = vst [vmem:[%s4667_s24 + $0x30] sm:$0xff] %v2607_v10  ;;  %2614 = vst [vmem:[%s4667_s24 + $0x28] sm:$0xff] %v2606_v38  ;;  %v2575_v33 = vpop.permute.xlu1 %2574 }
0x1024   :  { %v2599_v14 = vsel %vm814_vm1, %v2591_v25, %v2575_v33 }
0x1025   :  { %v2608_v62 = vsel %vm2600_vm3, %v2599_v14, 0.0 }
0x1026   :  { %2616 = vst [vmem:[%s4667_s24 + $0x38] sm:$0xff] %v2608_v62 }
0x1027   :  { %3628 = dma.done.wait [#allocation4], 1024  }
0x1028   :  { %3629 = vsyncadd [#allocation4], 4294966272 }
0x1029   :  { %2636 = vsyncpa [#allocation3], 1 }
0x102a   :  { %2637 = vsyncpa [#allocation6], 1 }
0x102b   :  { %2638 = vsyncpa [#allocation9], 1 }
0x102c   :  { %2639 = vsyncpa [#allocation12], 1 }
0x102d   :  { %2640 = vsyncpa [#allocation15], 1 }
0x102e   :  { %2641 = vsyncpa [#allocation18], 1 }
0x102f   :  { %2642 = vsyncpa [#allocation4], 1 }

</bundles_post_ra>
